<compile_context>
chip_gen: v7x
topology: tpu7x:2x2x1
jax: 0.10.0
libtpu: 0.0.40
codegen_flags: <defaults>
</compile_context>

<pallas_src>
import functools

import jax
import jax.numpy as jnp
from jax.experimental import pallas as pl
from jax.experimental.pallas import tpu as pltpu


def _round_up(n, m):
    return ((n + m - 1) // m) * m


def _pad2d(a, rows, cols):
    return jnp.pad(a, ((0, rows - a.shape[0]), (0, cols - a.shape[1])))


def _mlp_kernel(x_ref,
                w1_ref, b1_ref,
                w2_ref, b2_ref,
                w3_ref, b3_ref,
                w4_ref, b4_ref,
                w5_ref, b5_ref,
                o_ref):
    h = x_ref[...]                                                   # bf16 [TM, d0p]

    z = jnp.dot(h, w1_ref[...], preferred_element_type=jnp.float32) + b1_ref[...]
    h = jnp.maximum(z, 0.0).astype(jnp.bfloat16)
    # TODO(synk): dropout after each hidden layer treated as identity.
    z = jnp.dot(h, w2_ref[...], preferred_element_type=jnp.float32) + b2_ref[...]
    h = jnp.maximum(z, 0.0).astype(jnp.bfloat16)
    z = jnp.dot(h, w3_ref[...], preferred_element_type=jnp.float32) + b3_ref[...]
    h = jnp.maximum(z, 0.0).astype(jnp.bfloat16)
    z = jnp.dot(h, w4_ref[...], preferred_element_type=jnp.float32) + b4_ref[...]
    h = jnp.maximum(z, 0.0).astype(jnp.bfloat16)
    z = jnp.dot(h, w5_ref[...], preferred_element_type=jnp.float32) + b5_ref[...]
    o_ref[...] = jax.nn.sigmoid(z)                                   # f32


def prepare_params(params):
    """One-time: pad feature dims to multiples of 128, cast weights to bf16.

    Returns a flat tuple (w1, b1, ..., w5, b5) ready for the kernel; weights
    are bf16 [in_p, out_p], biases are f32 [1, out_p].
    """
    flat = []
    for li in range(5):
        w = jnp.asarray(params[f"w{li + 1}"], jnp.float32)   # [in, out]
        b = jnp.asarray(params[f"b{li + 1}"], jnp.float32)   # [out]
        pi = _round_up(w.shape[0], 128)
        po = _round_up(w.shape[1], 128)
        flat.append(_pad2d(w, pi, po).astype(jnp.bfloat16))
        flat.append(_pad2d(b[None, :], 1, po))
    return tuple(flat)


@functools.partial(jax.jit, static_argnames=("output_size", "batch_tile"))
def feedforward_network(x, padded_params, output_size=100, batch_tile=256):
    """x: [batch, input_size] float32. padded_params: from prepare_params()."""
    batch, _ = x.shape
    d0p = padded_params[0].shape[0]     # padded input dim
    dop = padded_params[-2].shape[1]    # padded output dim

    # Batch tile: multiple of 16 (bf16 sublane packing), capped to keep
    # VMEM/f32 intermediates bounded on all generations (v7x: 64 MiB physical).
    tm = min(batch_tile, _round_up(batch, 16))
    pbatch = _round_up(batch, tm)
    grid = (pbatch // tm,)

    x_p = _pad2d(x.astype(jnp.float32), pbatch, d0p).astype(jnp.bfloat16)

    act_spec = pl.BlockSpec((tm, d0p), lambda i: (i, 0))
    out_spec = pl.BlockSpec((tm, dop), lambda i: (i, 0))
    param_specs = [pl.BlockSpec(p.shape, lambda i: (0, 0)) for p in padded_params]

    out_p = pl.pallas_call(
        _mlp_kernel,
        out_shape=jax.ShapeDtypeStruct((pbatch, dop), jnp.float32),
        grid=grid,
        in_specs=[act_spec] + param_specs,
        out_specs=out_spec,
        compiler_params=pltpu.CompilerParams(
            dimension_semantics=("parallel",)),
    )(x_p, *padded_params)

    return out_p[:batch, :output_size]


def init_params(key, input_size=100, output_size=100):
    """Deterministic init: Kaiming-uniform-ish like nn.Linear defaults."""
    dims = [input_size, 700, 500, 300, 250, output_size]
    params = {}
    for li in range(5):
        fan_in, fan_out = dims[li], dims[li + 1]
        key, kw, kb = jax.random.split(key, 3)
        bound = 1.0 / jnp.sqrt(fan_in)
        params[f"w{li + 1}"] = jax.random.uniform(
            kw, (fan_in, fan_out), jnp.float32, -bound, bound)
        params[f"b{li + 1}"] = jax.random.uniform(
            kb, (fan_out,), jnp.float32, -bound, bound)
    return params


def _reference(x, params):
    """Pure-JAX f32 reference (dropout as identity)."""
    h = x
    for li in range(1, 5):
        h = jnp.maximum(h @ params[f"w{li}"] + params[f"b{li}"], 0.0)
    return jax.nn.sigmoid(h @ params["w5"] + params["b5"])


if __name__ == "__main__":
    key = jax.random.PRNGKey(0)
    k_x, k_p = jax.random.split(key)

    batch, input_size, output_size = 8, 100, 100
    x = jax.random.normal(k_x, (batch, input_size), jnp.float32)
    params = init_params(k_p, input_size, output_size)

    padded_params = prepare_params(params)   # one-time pad + bf16 cast

    out = feedforward_network(x, padded_params, output_size=output_size)
    out = jax.block_until_ready(out)

    ref = _reference(x, params)
    assert out.shape == (batch, output_size)
    # bf16 weights/activations (f32 accumulation) vs f32 reference.
    assert jnp.allclose(out, ref, atol=2e-2, rtol=2e-2), float(
        jnp.max(jnp.abs(out - ref)))

    print("KERNEL_OK")
</pallas_src>

<mosaic_0001>
module attributes {stable_mosaic.version = 11 : i64} {
  func.func @_mlp_kernel(%arg0: i32, %arg1: memref<16x128xbf16, #tpu.memory_space<vmem>>, %arg2: memref<128x768xbf16, #tpu.memory_space<vmem>>, %arg3: memref<1x768xf32, #tpu.memory_space<vmem>>, %arg4: memref<768x512xbf16, #tpu.memory_space<vmem>>, %arg5: memref<1x512xf32, #tpu.memory_space<vmem>>, %arg6: memref<512x384xbf16, #tpu.memory_space<vmem>>, %arg7: memref<1x384xf32, #tpu.memory_space<vmem>>, %arg8: memref<384x256xbf16, #tpu.memory_space<vmem>>, %arg9: memref<1x256xf32, #tpu.memory_space<vmem>>, %arg10: memref<256x128xbf16, #tpu.memory_space<vmem>>, %arg11: memref<1x128xf32, #tpu.memory_space<vmem>>, %arg12: memref<16x128xf32, #tpu.memory_space<vmem>>) attributes {dimension_semantics = [#tpu.dimension_semantics<parallel>], iteration_bounds = array<i64: 1>, scalar_prefetch = 0 : i64, scratch_operands = 0 : i64, tpu.core_type = #tpu.core_type<tc>, window_params = [{transform_indices = @transform_0, window_bounds = array<i64: 16, 128>}, {pipeline_mode = #tpu.pipeline_mode<synchronous>, transform_indices = @transform_1, window_bounds = array<i64: 128, 768>}, {pipeline_mode = #tpu.pipeline_mode<synchronous>, transform_indices = @transform_2, window_bounds = array<i64: 1, 768>}, {pipeline_mode = #tpu.pipeline_mode<synchronous>, transform_indices = @transform_3, window_bounds = array<i64: 768, 512>}, {pipeline_mode = #tpu.pipeline_mode<synchronous>, transform_indices = @transform_4, window_bounds = array<i64: 1, 512>}, {pipeline_mode = #tpu.pipeline_mode<synchronous>, transform_indices = @transform_5, window_bounds = array<i64: 512, 384>}, {pipeline_mode = #tpu.pipeline_mode<synchronous>, transform_indices = @transform_6, window_bounds = array<i64: 1, 384>}, {pipeline_mode = #tpu.pipeline_mode<synchronous>, transform_indices = @transform_7, window_bounds = array<i64: 384, 256>}, {pipeline_mode = #tpu.pipeline_mode<synchronous>, transform_indices = @transform_8, window_bounds = array<i64: 1, 256>}, {pipeline_mode = #tpu.pipeline_mode<synchronous>, transform_indices = @transform_9, window_bounds = array<i64: 256, 128>}, {pipeline_mode = #tpu.pipeline_mode<synchronous>, transform_indices = @transform_10, window_bounds = array<i64: 1, 128>}, {transform_indices = @transform_11, window_bounds = array<i64: 16, 128>}]} {
    %c0 = arith.constant 0 : index
    %c0_0 = arith.constant 0 : index
    %0 = vector.load %arg1[%c0, %c0_0] : memref<16x128xbf16, #tpu.memory_space<vmem>>, vector<16x128xbf16>
    %c0_1 = arith.constant 0 : index
    %c0_2 = arith.constant 0 : index
    %1 = vector.load %arg2[%c0_1, %c0_2] : memref<128x768xbf16, #tpu.memory_space<vmem>>, vector<128x768xbf16>
    %cst = arith.constant dense<0.000000e+00> : vector<16x768xf32>
    %2 = tpu.matmul %0, %1, %cst {dimension_numbers = #tpu.dot_dimension_numbers<[1], [0], [0], [1], [0, 0, 1, 1], [], []>} : vector<16x128xbf16>, vector<128x768xbf16>, vector<16x768xf32> -> vector<16x768xf32>
    %c0_3 = arith.constant 0 : index
    %c0_4 = arith.constant 0 : index
    %3 = vector.load %arg3[%c0_3, %c0_4] : memref<1x768xf32, #tpu.memory_space<vmem>>, vector<1x768xf32>
    %4 = vector.broadcast %3 : vector<1x768xf32> to vector<16x768xf32>
    %5 = arith.addf %2, %4 : vector<16x768xf32>
    %cst_5 = arith.constant 0.000000e+00 : f32
    %6 = vector.broadcast %cst_5 : f32 to vector<16x768xf32>
    %7 = arith.maximumf %5, %6 : vector<16x768xf32>
    %8 = arith.truncf %7 : vector<16x768xf32> to vector<16x768xbf16>
    %c0_6 = arith.constant 0 : index
    %c0_7 = arith.constant 0 : index
    %9 = vector.load %arg4[%c0_6, %c0_7] : memref<768x512xbf16, #tpu.memory_space<vmem>>, vector<768x512xbf16>
    %cst_8 = arith.constant dense<0.000000e+00> : vector<16x512xf32>
    %10 = tpu.matmul %8, %9, %cst_8 {dimension_numbers = #tpu.dot_dimension_numbers<[1], [0], [0], [1], [0, 0, 1, 1], [], []>} : vector<16x768xbf16>, vector<768x512xbf16>, vector<16x512xf32> -> vector<16x512xf32>
    %c0_9 = arith.constant 0 : index
    %c0_10 = arith.constant 0 : index
    %11 = vector.load %arg5[%c0_9, %c0_10] : memref<1x512xf32, #tpu.memory_space<vmem>>, vector<1x512xf32>
    %12 = vector.broadcast %11 : vector<1x512xf32> to vector<16x512xf32>
    %13 = arith.addf %10, %12 : vector<16x512xf32>
    %cst_11 = arith.constant 0.000000e+00 : f32
    %14 = vector.broadcast %cst_11 : f32 to vector<16x512xf32>
    %15 = arith.maximumf %13, %14 : vector<16x512xf32>
    %16 = arith.truncf %15 : vector<16x512xf32> to vector<16x512xbf16>
    %c0_12 = arith.constant 0 : index
    %c0_13 = arith.constant 0 : index
    %17 = vector.load %arg6[%c0_12, %c0_13] : memref<512x384xbf16, #tpu.memory_space<vmem>>, vector<512x384xbf16>
    %cst_14 = arith.constant dense<0.000000e+00> : vector<16x384xf32>
    %18 = tpu.matmul %16, %17, %cst_14 {dimension_numbers = #tpu.dot_dimension_numbers<[1], [0], [0], [1], [0, 0, 1, 1], [], []>} : vector<16x512xbf16>, vector<512x384xbf16>, vector<16x384xf32> -> vector<16x384xf32>
    %c0_15 = arith.constant 0 : index
    %c0_16 = arith.constant 0 : index
    %19 = vector.load %arg7[%c0_15, %c0_16] : memref<1x384xf32, #tpu.memory_space<vmem>>, vector<1x384xf32>
    %20 = vector.broadcast %19 : vector<1x384xf32> to vector<16x384xf32>
    %21 = arith.addf %18, %20 : vector<16x384xf32>
    %cst_17 = arith.constant 0.000000e+00 : f32
    %22 = vector.broadcast %cst_17 : f32 to vector<16x384xf32>
    %23 = arith.maximumf %21, %22 : vector<16x384xf32>
    %24 = arith.truncf %23 : vector<16x384xf32> to vector<16x384xbf16>
    %c0_18 = arith.constant 0 : index
    %c0_19 = arith.constant 0 : index
    %25 = vector.load %arg8[%c0_18, %c0_19] : memref<384x256xbf16, #tpu.memory_space<vmem>>, vector<384x256xbf16>
    %cst_20 = arith.constant dense<0.000000e+00> : vector<16x256xf32>
    %26 = tpu.matmul %24, %25, %cst_20 {dimension_numbers = #tpu.dot_dimension_numbers<[1], [0], [0], [1], [0, 0, 1, 1], [], []>} : vector<16x384xbf16>, vector<384x256xbf16>, vector<16x256xf32> -> vector<16x256xf32>
    %c0_21 = arith.constant 0 : index
    %c0_22 = arith.constant 0 : index
    %27 = vector.load %arg9[%c0_21, %c0_22] : memref<1x256xf32, #tpu.memory_space<vmem>>, vector<1x256xf32>
    %28 = vector.broadcast %27 : vector<1x256xf32> to vector<16x256xf32>
    %29 = arith.addf %26, %28 : vector<16x256xf32>
    %cst_23 = arith.constant 0.000000e+00 : f32
    %30 = vector.broadcast %cst_23 : f32 to vector<16x256xf32>
    %31 = arith.maximumf %29, %30 : vector<16x256xf32>
    %32 = arith.truncf %31 : vector<16x256xf32> to vector<16x256xbf16>
    %c0_24 = arith.constant 0 : index
    %c0_25 = arith.constant 0 : index
    %33 = vector.load %arg10[%c0_24, %c0_25] : memref<256x128xbf16, #tpu.memory_space<vmem>>, vector<256x128xbf16>
    %cst_26 = arith.constant dense<0.000000e+00> : vector<16x128xf32>
    %34 = tpu.matmul %32, %33, %cst_26 {dimension_numbers = #tpu.dot_dimension_numbers<[1], [0], [0], [1], [0, 0, 1, 1], [], []>} : vector<16x256xbf16>, vector<256x128xbf16>, vector<16x128xf32> -> vector<16x128xf32>
    %c0_27 = arith.constant 0 : index
    %c0_28 = arith.constant 0 : index
    %35 = vector.load %arg11[%c0_27, %c0_28] : memref<1x128xf32, #tpu.memory_space<vmem>>, vector<1x128xf32>
    %36 = vector.broadcast %35 : vector<1x128xf32> to vector<16x128xf32>
    %37 = arith.addf %34, %36 : vector<16x128xf32>
    %38 = arith.negf %37 : vector<16x128xf32>
    %39 = math.exp %38 : vector<16x128xf32>
    %cst_29 = arith.constant 1.000000e+00 : f32
    %40 = vector.broadcast %cst_29 : f32 to vector<16x128xf32>
    %41 = arith.addf %40, %39 : vector<16x128xf32>
    %42 = arith.divf %40, %41 : vector<16x128xf32>
    %c0_30 = arith.constant 0 : index
    %c0_31 = arith.constant 0 : index
    %43 = vector.load %arg12[%c0_30, %c0_31] : memref<16x128xf32, #tpu.memory_space<vmem>>, vector<16x128xf32>
    tpu.vector_store %arg12[%c0_30, %c0_31], %42 {strides = array<i32>} : memref<16x128xf32, #tpu.memory_space<vmem>>, vector<16x128xf32>,
    return
  }
  func.func @transform_0(%arg0: i32) -> (i32, i32) {
    %c0_i32 = arith.constant 0 : i32
    %c0_i32_0 = arith.constant 0 : i32
    return %arg0, %c0_i32 : i32, i32
  }
  func.func @transform_1(%arg0: i32) -> (i32, i32) {
    %c0_i32 = arith.constant 0 : i32
    %c0_i32_0 = arith.constant 0 : i32
    %c0_i32_1 = arith.constant 0 : i32
    return %c0_i32, %c0_i32_0 : i32, i32
  }
  func.func @transform_2(%arg0: i32) -> (i32, i32) {
    %c0_i32 = arith.constant 0 : i32
    %c0_i32_0 = arith.constant 0 : i32
    %c0_i32_1 = arith.constant 0 : i32
    return %c0_i32, %c0_i32_0 : i32, i32
  }
  func.func @transform_3(%arg0: i32) -> (i32, i32) {
    %c0_i32 = arith.constant 0 : i32
    %c0_i32_0 = arith.constant 0 : i32
    %c0_i32_1 = arith.constant 0 : i32
    return %c0_i32, %c0_i32_0 : i32, i32
  }
  func.func @transform_4(%arg0: i32) -> (i32, i32) {
    %c0_i32 = arith.constant 0 : i32
    %c0_i32_0 = arith.constant 0 : i32
    %c0_i32_1 = arith.constant 0 : i32
    return %c0_i32, %c0_i32_0 : i32, i32
  }
  func.func @transform_5(%arg0: i32) -> (i32, i32) {
    %c0_i32 = arith.constant 0 : i32
    %c0_i32_0 = arith.constant 0 : i32
    %c0_i32_1 = arith.constant 0 : i32
    return %c0_i32, %c0_i32_0 : i32, i32
  }
  func.func @transform_6(%arg0: i32) -> (i32, i32) {
    %c0_i32 = arith.constant 0 : i32
    %c0_i32_0 = arith.constant 0 : i32
    %c0_i32_1 = arith.constant 0 : i32
    return %c0_i32, %c0_i32_0 : i32, i32
  }
  func.func @transform_7(%arg0: i32) -> (i32, i32) {
    %c0_i32 = arith.constant 0 : i32
    %c0_i32_0 = arith.constant 0 : i32
    %c0_i32_1 = arith.constant 0 : i32
    return %c0_i32, %c0_i32_0 : i32, i32
  }
  func.func @transform_8(%arg0: i32) -> (i32, i32) {
    %c0_i32 = arith.constant 0 : i32
    %c0_i32_0 = arith.constant 0 : i32
    %c0_i32_1 = arith.constant 0 : i32
    return %c0_i32, %c0_i32_0 : i32, i32
  }
  func.func @transform_9(%arg0: i32) -> (i32, i32) {
    %c0_i32 = arith.constant 0 : i32
    %c0_i32_0 = arith.constant 0 : i32
    %c0_i32_1 = arith.constant 0 : i32
    return %c0_i32, %c0_i32_0 : i32, i32
  }
  func.func @transform_10(%arg0: i32) -> (i32, i32) {
    %c0_i32 = arith.constant 0 : i32
    %c0_i32_0 = arith.constant 0 : i32
    %c0_i32_1 = arith.constant 0 : i32
    return %c0_i32, %c0_i32_0 : i32, i32
  }
  func.func @transform_11(%arg0: i32) -> (i32, i32) {
    %c0_i32 = arith.constant 0 : i32
    %c0_i32_0 = arith.constant 0 : i32
    return %arg0, %c0_i32 : i32, i32
  }
}

</mosaic_0001>

<bundles_post_ra>
// kernel: feedforward_network.1
= control target key start
LH: loop header
LB: loop body
LE: loop exit
PB: predicated region body
PF: predicated region fallthrough
CT: control target
= control target key end

     0   :  { %16 = vsyncpa [#allocation3], 0  ;;  %s4898_s0 = inlined_call_operand.vmem [shape: bf16[16,128], index: 0, kind: input, shape index: {}]   ;;  %s4899_s1 = inlined_call_operand.hbm [shape: bf16[128,768], index: 1, kind: input, shape index: {}]   ;;  %s4900_s2 = inlined_call_operand.vmem [shape: f32[1,768], index: 2, kind: input, shape index: {}]   ;;  %s4901_s3 = inlined_call_operand.hbm [shape: bf16[768,512], index: 3, kind: input, shape index: {}]   ;;  %s4902_s4 = inlined_call_operand.vmem [shape: f32[1,512], index: 4, kind: input, shape index: {}]   ;;  %s4903_s5 = inlined_call_operand.hbm [shape: bf16[512,384], index: 5, kind: input, shape index: {}]   ;;  %s4904_s6 = inlined_call_operand.vmem [shape: f32[1,384], index: 6, kind: input, shape index: {}]   ;;  %s4905_s7 = inlined_call_operand.hbm [shape: bf16[384,256], index: 7, kind: input, shape index: {}]   ;;  %s4906_s8 = inlined_call_operand.vmem [shape: f32[1,256], index: 8, kind: input, shape index: {}]   ;;  %s4907_s9 = inlined_call_operand.hbm [shape: bf16[256,128], index: 9, kind: input, shape index: {}]   ;;  %s4908_s10 = inlined_call_operand.vmem [shape: f32[1,128], index: 10, kind: input, shape index: {}]   ;;  %s4909_s11 = inlined_call_operand.vmem [shape: f32[16,128], index: 11, kind: output, shape index: {}]  }
   0x1   :  { %17 = vsyncpa [#allocation5], 0 }
   0x2   :  { %18 = vsyncpa [#allocation8], 0  ;;  %s4676_s17 = smov [#allocation4]   ;;  %s4560_s21 = scalar_lea.hbm %s4901_s3, 24576 }
   0x3   :  { %s40_s18 = sshll.u32 %s4676_s17, 4  ;;  %p4561_p0 = scmp.ne.s32.totalorder %s4901_s3, %s4560_s21  ;;  %s41_s18 = int_to_ptr.vmem [resolvable:$true] %s40_s18 }
   0x4   :  { %p4564_p1 = scmp.lt.u32.totalorder %s4560_s21, %s4901_s3 }
   0x6   :  { %p4566_p2 = pnand %p4564_p1, %p4561_p0 }
   0x8   :  { %4569 = shalt.err (!%p4566_p2)
}
   0x9   :  { %s4570_s26 = scalar_lea.vmem %s41_s18, 24576  ;;  %p4575_p4 = scmp.lt.s32.totalorder %s41_s18, %s41_s18 }
   0xa   :  { %p4571_p3 = scmp.ne.s32.totalorder %s41_s18, %s4570_s26  ;;  %p4576_p5 = scmp.lt.s32.totalorder %s4570_s26, %s4570_s26 }
   0xc   :  { %p4577_p6 = por %p4576_p5, %p4575_p4 }
   0xe   :  { %p4578_p7 = pnand %p4577_p6, %p4571_p3 }
  0x10   :  { %4581 = shalt.err (!%p4578_p7)
}
  0x11   :  { %s4677_s27 = smov 256   ;;  %s4678_s28 = smov 16  }
  0x12   :  { %46 = dma.hbm_to_vmem [thread:$0]  %s4901_s3, 24576, %s41_s18, [#allocation5], %s4677_s27, %s4677_s27, %s4678_s28  }
  0x13   :  { %s4679_s12 = smov [#allocation7]   ;;  %s4582_s16 = scalar_lea.hbm %s4905_s7, 6144 }
  0x14   :  { %s68_s13 = sshll.u32 %s4679_s12, 4  ;;  %p4583_p8 = scmp.ne.s32.totalorder %s4905_s7, %s4582_s16  ;;  %s69_s13 = int_to_ptr.vmem [resolvable:$true] %s68_s13 }
  0x15   :  { %p4586_p9 = scmp.lt.u32.totalorder %s4582_s16, %s4905_s7 }
  0x17   :  { %p4588_p10 = pnand %p4586_p9, %p4583_p8 }
  0x19   :  { %4591 = shalt.err (!%p4588_p10)
}
  0x1a   :  { %s4592_s22 = scalar_lea.vmem %s69_s13, 6144  ;;  %p4597_p12 = scmp.lt.s32.totalorder %s69_s13, %s69_s13 }
  0x1b   :  { %p4593_p11 = scmp.ne.s32.totalorder %s69_s13, %s4592_s22  ;;  %p4598_p13 = scmp.lt.s32.totalorder %s4592_s22, %s4592_s22 }
  0x1d   :  { %p4599_p0 = por %p4598_p13, %p4597_p12 }
  0x1f   :  { %p4600_p1 = pnand %p4599_p0, %p4593_p11 }
  0x21   :  { %4603 = shalt.err (!%p4600_p1)
}
  0x22   :  { %s4680_s3 = smov 128   ;;  %s4681_s18 = smov 8  }
  0x23   :  { %74 = dma.hbm_to_vmem [thread:$0]  %s4905_s7, 6144, %s69_s13, [#allocation8], %s4680_s3, %s4680_s3, %s4681_s18  }
  0x24   :  { %s4682_s25 = smov [#allocation2]   ;;  %s4604_s29 = scalar_lea.hbm %s4899_s1, 6144 }
  0x25   :  { %s26_s26 = sshll.u32 %s4682_s25, 4  ;;  %p4605_p2 = scmp.ne.s32.totalorder %s4899_s1, %s4604_s29  ;;  %s27_s26 = int_to_ptr.vmem [resolvable:$true] %s26_s26 }
  0x26   :  { %p4608_p3 = scmp.lt.u32.totalorder %s4604_s29, %s4899_s1 }
  0x28   :  { %p4610_p4 = pnand %p4608_p3, %p4605_p2 }
  0x2a   :  { %4613 = shalt.err (!%p4610_p4)
}
  0x2b   :  { %s4614_s16 = scalar_lea.vmem %s27_s26, 6144  ;;  %p4619_p6 = scmp.lt.s32.totalorder %s27_s26, %s27_s26 }
  0x2c   :  { %p4615_p5 = scmp.ne.s32.totalorder %s27_s26, %s4614_s16  ;;  %p4620_p7 = scmp.lt.s32.totalorder %s4614_s16, %s4614_s16 }
  0x2e   :  { %p4621_p8 = por %p4620_p7, %p4619_p6 }
  0x30   :  { %p4622_p9 = pnand %p4621_p8, %p4615_p5 }
  0x32   :  { %4625 = shalt.err (!%p4622_p9)
}
  0x33   :  { %s4683_s7 = smov 384   ;;  %s4684_s13 = smov 24  }
  0x34   :  { %32 = dma.hbm_to_vmem [thread:$0]  %s4899_s1, 6144, %s27_s26, [#allocation3], %s4683_s7, %s4683_s7, %s4684_s13  }
  0x35   :  { %s4685_s20 = smov [#allocation6]   ;;  %s4626_s18 = scalar_lea.hbm %s4903_s5, 12288 }
  0x36   :  { %s54_s21 = sshll.u32 %s4685_s20, 4  ;;  %p4627_p10 = scmp.ne.s32.totalorder %s4903_s5, %s4626_s18  ;;  %s55_s21 = int_to_ptr.vmem [resolvable:$true] %s54_s21 }
  0x37   :  { %p4630_p11 = scmp.lt.u32.totalorder %s4626_s18, %s4903_s5 }
  0x39   :  { %p4632_p12 = pnand %p4630_p11, %p4627_p10 }
  0x3b   :  { %4635 = shalt.err (!%p4632_p12)
}
  0x3c   :  { %s4636_s28 = scalar_lea.vmem %s55_s21, 12288  ;;  %p4641_p0 = scmp.lt.s32.totalorder %s55_s21, %s55_s21 }
  0x3d   :  { %p4637_p13 = scmp.ne.s32.totalorder %s55_s21, %s4636_s28  ;;  %p4642_p1 = scmp.lt.s32.totalorder %s4636_s28, %s4636_s28 }
  0x3f   :  { %p4643_p2 = por %p4642_p1, %p4641_p0 }
  0x41   :  { %p4644_p3 = pnand %p4643_p2, %p4637_p13 }
  0x43   :  { %4647 = shalt.err (!%p4644_p3)
}
  0x44   :  { %s4686_s1 = smov 192   ;;  %s4687_s26 = smov 12  }
  0x45   :  { %60 = dma.hbm_to_vmem [thread:$0]  %s4903_s5, 12288, %s55_s21, [#allocation5], %s4686_s1, %s4686_s1, %s4687_s26  }
  0x46   :  { %s4688_s12 = smov [#allocation9]   ;;  %s4648_s7 = scalar_lea.hbm %s4907_s9, 2048 }
  0x47   :  { %s82_s14 = sshll.u32 %s4688_s12, 4  ;;  %p4649_p4 = scmp.ne.s32.totalorder %s4907_s9, %s4648_s7  ;;  %s83_s14 = int_to_ptr.vmem [resolvable:$true] %s82_s14 }
  0x48   :  { %p4652_p5 = scmp.lt.u32.totalorder %s4648_s7, %s4907_s9 }
  0x4a   :  { %p4654_p6 = pnand %p4652_p5, %p4649_p4 }
  0x4c   :  { %4657 = shalt.err (!%p4654_p6)
}
  0x4d   :  { %s4658_s22 = scalar_lea.vmem %s83_s14, 2048  ;;  %p4663_p8 = scmp.lt.s32.totalorder %s83_s14, %s83_s14 }
  0x4e   :  { %p4659_p7 = scmp.ne.s32.totalorder %s83_s14, %s4658_s22  ;;  %p4664_p9 = scmp.lt.s32.totalorder %s4658_s22, %s4658_s22 }
  0x50   :  { %p4665_p10 = por %p4664_p9, %p4663_p8 }
  0x52   :  { %p4666_p11 = pnand %p4665_p10, %p4659_p7 }
  0x54   :  { %4669 = shalt.err (!%p4666_p11)
}
  0x55   :  { %s4689_s5 = smov 64   ;;  %s4690_s21 = smov 4  }
  0x56   :  { %88 = dma.hbm_to_vmem [thread:$0]  %s4907_s9, 2048, %s83_s14, [#allocation8], %s4689_s5, %s4689_s5, %s4690_s21  }
  0x57   :  { %4670 = dma.done.wait [#allocation3], 6144  }
  0x58   :  { %4671 = vsyncadd [#allocation3], 4294961152 }
  0x59   :  { %4672 = dma.done.wait [#allocation5], 36864  }
  0x5a   :  { %4673 = vsyncadd [#allocation5], 4294930432 }
  0x5b   :  { %4674 = dma.done.wait [#allocation8], 8192  }
  0x5c   :  { %4675 = vsyncadd [#allocation8], 4294959104  ;;  %v4691_v0 = vmov 0   ;;  %v3975_v1 = vld [vmem:[#allocation2 + $0x4] ss:$24 sps:$4 sm:$0xff]  }
  0x5d   :  { %467 = vmatprep.mubr.bf16.mxu0 %v4691_v0  ;;  %510 = vmatprep.mubr.bf16.mxu1 %v4691_v0  ;;  %v3977_v2 = vld [vmem:[#allocation2] ss:$24 sps:$4 sm:$0xff]   ;;  %v3978_v3 = vld [vmem:[#allocation2 + $0x34] ss:$24 sps:$4 sm:$0xff]   ;;  %v3980_v4 = vld [vmem:[#allocation2 + $0x30] ss:$24 sps:$4 sm:$0xff]  }
  0x5e   :  { %435 = vmatprep.subr.bf16.mxu0 %v3975_v1  ;;  %v3981_v5 = vld [vmem:[#allocation2 + $0x64] ss:$24 sps:$4 sm:$0xff]   ;;  %v3983_v6 = vld [vmem:[#allocation2 + $0x60] ss:$24 sps:$4 sm:$0xff]   ;;  %v3984_v7 = vld [vmem:[#allocation2 + $0x94] ss:$24 sps:$4 sm:$0xff]  }
  0x5f   :  { %436 = vmatpush1.bf16.msra.mxu0 %v3977_v2  ;;  %v3986_v8 = vld [vmem:[#allocation2 + $0x90] ss:$24 sps:$4 sm:$0xff]   ;;  %v3987_v9 = vld [vmem:[#allocation2 + $0xc4] ss:$24 sps:$4 sm:$0xff]   ;;  %v3989_v13 = vld [vmem:[#allocation2 + $0xc0] ss:$24 sps:$4 sm:$0xff]  }
  0x60   :  { %437 = vmatprep.subr.bf16.mxu0 %v3978_v3  ;;  %v4000_v10 = vld [vmem:[#allocation2 + $0xc] ss:$24 sps:$4 sm:$0xff]   ;;  %v4002_v11 = vld [vmem:[#allocation2 + $0x8] ss:$24 sps:$4 sm:$0xff]   ;;  %v4003_v12 = vld [vmem:[#allocation2 + $0x3c] ss:$24 sps:$4 sm:$0xff]  }
  0x61   :  { %478 = vmatprep.subr.bf16.mxu1 %v4000_v10  ;;  %v4005_v14 = vld [vmem:[#allocation2 + $0x38] ss:$24 sps:$4 sm:$0xff]   ;;  %v3990_v15 = vld [vmem:[#allocation2 + $0xf4] ss:$24 sps:$4 sm:$0xff]   ;;  %v4008_v18 = vld [vmem:[#allocation2 + $0x68] ss:$24 sps:$4 sm:$0xff]  }
  0x62   :  { %479 = vmatpush1.bf16.msra.mxu1 %v4002_v11  ;;  %v4006_v16 = vld [vmem:[#allocation2 + $0x6c] ss:$24 sps:$4 sm:$0xff]   ;;  %v3992_v17 = vld [vmem:[#allocation2 + $0xf0] ss:$24 sps:$4 sm:$0xff]   ;;  %v4009_v20 = vld [vmem:[#allocation2 + $0x9c] ss:$24 sps:$4 sm:$0xff]  }
  0x63   :  { %438 = vmatpush1.bf16.msra.mxu0 %v3980_v4  ;;  %480 = vmatprep.subr.bf16.mxu1 %v4003_v12  ;;  %v3993_v19 = vld [vmem:[#allocation2 + $0x124] ss:$24 sps:$4 sm:$0xff]   ;;  %v3995_v21 = vld [vmem:[#allocation2 + $0x120] ss:$24 sps:$4 sm:$0xff]   ;;  %v3996_v23 = vld [vmem:[#allocation2 + $0x154] ss:$24 sps:$4 sm:$0xff]  }
  0x64   :  { %439 = vmatprep.subr.bf16.mxu0 %v3981_v5  ;;  %v4011_v22 = vld [vmem:[#allocation2 + $0x98] ss:$24 sps:$4 sm:$0xff]   ;;  %v4012_v24 = vld [vmem:[#allocation2 + $0xcc] ss:$24 sps:$4 sm:$0xff]   ;;  %v4014_v26 = vld [vmem:[#allocation2 + $0xc8] ss:$24 sps:$4 sm:$0xff]  }
  0x65   :  { %v3998_v25 = vld [vmem:[#allocation2 + $0x150] ss:$24 sps:$4 sm:$0xff]   ;;  %v4015_v27 = vld [vmem:[#allocation2 + $0xfc] ss:$24 sps:$4 sm:$0xff]   ;;  %v4817_v29 = vld [vmem:[%s4898_s0] sm:$0xff]  }
  0x66   :  { %481 = vmatpush1.bf16.msra.mxu1 %v4005_v14  ;;  %v4026_v28 = vld [vmem:[#allocation2 + $0x14] ss:$24 sps:$4 sm:$0xff]   ;;  %v4017_v30 = vld [vmem:[#allocation2 + $0xf8] ss:$24 sps:$4 sm:$0xff]   ;;  %v4029_v33 = vld [vmem:[#allocation2 + $0x44] ss:$24 sps:$4 sm:$0xff]  }
  0x67   :  { %440 = vmatpush1.bf16.msra.mxu0 %v3983_v6  ;;  %482 = vmatprep.subr.bf16.mxu1 %v4006_v16  ;;  %v4024_v31 = vld [vmem:[#allocation2 + $0x10] ss:$24 sps:$4 sm:$0xff]   ;;  %v4018_v32 = vld [vmem:[#allocation2 + $0x12c] ss:$24 sps:$4 sm:$0xff]   ;;  %v4027_v35 = vld [vmem:[#allocation2 + $0x40] ss:$24 sps:$4 sm:$0xff]  }
  0x68   :  { %441 = vmatprep.subr.bf16.mxu0 %v3984_v7  ;;  %v4020_v34 = vld [vmem:[#allocation2 + $0x128] ss:$24 sps:$4 sm:$0xff]   ;;  %v4021_v36 = vld [vmem:[#allocation2 + $0x15c] ss:$24 sps:$4 sm:$0xff]   ;;  %v4023_v38 = vld [vmem:[#allocation2 + $0x158] ss:$24 sps:$4 sm:$0xff]  }
  0x69   :  { %v4032_v37 = vld [vmem:[#allocation2 + $0x74] ss:$24 sps:$4 sm:$0xff]   ;;  %v4030_v39 = vld [vmem:[#allocation2 + $0x70] ss:$24 sps:$4 sm:$0xff]   ;;  %v4035_v40 = vld [vmem:[#allocation2 + $0xa4] ss:$24 sps:$4 sm:$0xff]  }
  0x6a   :  { %483 = vmatpush1.bf16.msra.mxu1 %v4008_v18  ;;  %v4050_v41 = vld [vmem:[#allocation4 + $0x4] ss:$16 sps:$4 sm:$0xff]   ;;  %v4033_v42 = vld [vmem:[#allocation2 + $0xa0] ss:$24 sps:$4 sm:$0xff]   ;;  %v4036_v46 = vld [vmem:[#allocation2 + $0xd0] ss:$24 sps:$4 sm:$0xff]  }
  0x6b   :  { %442 = vmatpush1.bf16.msra.mxu0 %v3986_v8  ;;  %484 = vmatprep.subr.bf16.mxu1 %v4009_v20  ;;  %v4048_v43 = vld [vmem:[#allocation4] ss:$16 sps:$4 sm:$0xff]   ;;  %v4038_v44 = vld [vmem:[#allocation2 + $0xd4] ss:$24 sps:$4 sm:$0xff]   ;;  %v4041_v48 = vld [vmem:[#allocation2 + $0x104] ss:$24 sps:$4 sm:$0xff]  }
  0x6c   :  { %443 = vmatprep.subr.bf16.mxu0 %v3987_v9  ;;  %v4056_v45 = vld [vmem:[#allocation4 + $0x24] ss:$16 sps:$4 sm:$0xff]   ;;  %v4054_v47 = vld [vmem:[#allocation4 + $0x20] ss:$16 sps:$4 sm:$0xff]   ;;  %v4053_v60 = vld [vmem:[#allocation4 + $0xc] ss:$16 sps:$4 sm:$0xff]  }
  0x6d   :  { %v4062_v49 = vld [vmem:[#allocation4 + $0x44] ss:$16 sps:$4 sm:$0xff]   ;;  %v4039_v50 = vld [vmem:[#allocation2 + $0x100] ss:$24 sps:$4 sm:$0xff]   ;;  %v4042_v54 = vld [vmem:[#allocation2 + $0x130] ss:$24 sps:$4 sm:$0xff]  }
  0x6e   :  { %485 = vmatpush1.bf16.msra.mxu1 %v4011_v22  ;;  %v4060_v51 = vld [vmem:[#allocation4 + $0x40] ss:$16 sps:$4 sm:$0xff]   ;;  %v4044_v52 = vld [vmem:[#allocation2 + $0x134] ss:$24 sps:$4 sm:$0xff]   ;;  %v4047_v56 = vld [vmem:[#allocation2 + $0x164] ss:$24 sps:$4 sm:$0xff]  }
  0x6f   :  { %444 = vmatpush1.bf16.msra.mxu0 %v3989_v13  ;;  %486 = vmatprep.subr.bf16.mxu1 %v4012_v24  ;;  %v4068_v53 = vld [vmem:[#allocation4 + $0x64] ss:$16 sps:$4 sm:$0xff]   ;;  %v4066_v55 = vld [vmem:[#allocation4 + $0x60] ss:$16 sps:$4 sm:$0xff]   ;;  %v4051_v62 = vld [vmem:[#allocation4 + $0x8] ss:$16 sps:$4 sm:$0xff]  }
  0x70   :  { %445 = vmatprep.subr.bf16.mxu0 %v3990_v15  ;;  %v4074_v57 = vld [vmem:[#allocation4 + $0x84] ss:$16 sps:$4 sm:$0xff]   ;;  %v4045_v58 = vld [vmem:[#allocation2 + $0x160] ss:$24 sps:$4 sm:$0xff]   ;;  %v4059_v1 = vld [vmem:[#allocation4 + $0x2c] ss:$16 sps:$4 sm:$0xff]  }
  0x71   :  { %v4072_v59 = vld [vmem:[#allocation4 + $0x80] ss:$16 sps:$4 sm:$0xff]   ;;  %v4080_v61 = vld [vmem:[#allocation4 + $0xa4] ss:$16 sps:$4 sm:$0xff]   ;;  %v4057_v3 = vld [vmem:[#allocation4 + $0x28] ss:$16 sps:$4 sm:$0xff]  }
  0x72   :  { %487 = vmatpush1.bf16.msra.mxu1 %v4014_v26  ;;  %v4078_v63 = vld [vmem:[#allocation4 + $0xa0] ss:$16 sps:$4 sm:$0xff]   ;;  %v4086_v2 = vld [vmem:[#allocation4 + $0xc4] ss:$16 sps:$4 sm:$0xff]   ;;  %v4065_v5 = vld [vmem:[#allocation4 + $0x4c] ss:$16 sps:$4 sm:$0xff]  }
  0x73   :  { %446 = vmatpush1.bf16.msra.mxu0 %v3992_v17  ;;  %488 = vmatprep.subr.bf16.mxu1 %v4015_v27  ;;  %v4084_v4 = vld [vmem:[#allocation4 + $0xc0] ss:$16 sps:$4 sm:$0xff]   ;;  %v4092_v6 = vld [vmem:[#allocation4 + $0xe4] ss:$16 sps:$4 sm:$0xff]   ;;  %v4063_v7 = vld [vmem:[#allocation4 + $0x48] ss:$16 sps:$4 sm:$0xff]  }
  0x74   :  { %447 = vmatprep.subr.bf16.mxu0 %v3993_v19  ;;  %v4071_v8 = vld [vmem:[#allocation4 + $0x6c] ss:$16 sps:$4 sm:$0xff]   ;;  %v4090_v9 = vld [vmem:[#allocation4 + $0xe0] ss:$16 sps:$4 sm:$0xff]   ;;  %v4098_v10 = vld [vmem:[#allocation4 + $0x104] ss:$16 sps:$4 sm:$0xff]  }
  0x75   :  { %v4069_v11 = vld [vmem:[#allocation4 + $0x68] ss:$16 sps:$4 sm:$0xff]   ;;  %v4096_v12 = vld [vmem:[#allocation4 + $0x100] ss:$16 sps:$4 sm:$0xff]   ;;  %v4077_v13 = vld [vmem:[#allocation4 + $0x8c] ss:$16 sps:$4 sm:$0xff]  }
  0x76   :  { %489 = vmatpush1.bf16.msra.mxu1 %v4017_v30  ;;  %v4104_v14 = vld [vmem:[#allocation4 + $0x124] ss:$16 sps:$4 sm:$0xff]   ;;  %v4075_v15 = vld [vmem:[#allocation4 + $0x88] ss:$16 sps:$4 sm:$0xff]   ;;  %v4102_v16 = vld [vmem:[#allocation4 + $0x120] ss:$16 sps:$4 sm:$0xff]  }
  0x77   :  { %448 = vmatpush1.bf16.msra.mxu0 %v3995_v21  ;;  %490 = vmatprep.subr.bf16.mxu1 %v4018_v32  ;;  %v4083_v17 = vld [vmem:[#allocation4 + $0xac] ss:$16 sps:$4 sm:$0xff]   ;;  %v4110_v18 = vld [vmem:[#allocation4 + $0x144] ss:$16 sps:$4 sm:$0xff]   ;;  %v4081_v19 = vld [vmem:[#allocation4 + $0xa8] ss:$16 sps:$4 sm:$0xff]  }
  0x78   :  { %449 = vmatprep.subr.bf16.mxu0 %v3996_v23  ;;  %v4108_v20 = vld [vmem:[#allocation4 + $0x140] ss:$16 sps:$4 sm:$0xff]   ;;  %v4089_v21 = vld [vmem:[#allocation4 + $0xcc] ss:$16 sps:$4 sm:$0xff]   ;;  %v4116_v22 = vld [vmem:[#allocation4 + $0x164] ss:$16 sps:$4 sm:$0xff]  }
  0x79   :  { %v4087_v23 = vld [vmem:[#allocation4 + $0xc8] ss:$16 sps:$4 sm:$0xff]   ;;  %v4114_v24 = vld [vmem:[#allocation4 + $0x160] ss:$16 sps:$4 sm:$0xff]   ;;  %v4122_v26 = vld [vmem:[#allocation4 + $0x184] ss:$16 sps:$4 sm:$0xff]  }
  0x7a   :  { %491 = vmatpush1.bf16.msra.mxu1 %v4020_v34  ;;  %v4093_v27 = vld [vmem:[#allocation4 + $0xe8] ss:$16 sps:$4 sm:$0xff]   ;;  %v4128_v30 = vld [vmem:[#allocation4 + $0x1a4] ss:$16 sps:$4 sm:$0xff]   ;;  %v4126_v32 = vld [vmem:[#allocation4 + $0x1a0] ss:$16 sps:$4 sm:$0xff]  }
  0x7b   :  { %450 = vmatpush1.bf16.msra.mxu0 %v3998_v25  ;;  %492 = vmatprep.subr.bf16.mxu1 %v4021_v36  ;;  %v4095_v25 = vld [vmem:[#allocation4 + $0xec] ss:$16 sps:$4 sm:$0xff]   ;;  %v4105_v34 = vld [vmem:[#allocation4 + $0x128] ss:$16 sps:$4 sm:$0xff]  }
  0x7c   :  { %521 = vmatprep.subr.bf16.mxu0 %v4026_v28  ;;  %v4120_v28 = vld [vmem:[#allocation4 + $0x180] ss:$16 sps:$4 sm:$0xff]   ;;  %v4111_v36 = vld [vmem:[#allocation4 + $0x148] ss:$16 sps:$4 sm:$0xff]  }
  0x7e   :  { %468 = vmatmul.mubr.bf16.vlgmr.msra.gmra.mrb[0].mxu0 %v4817_v29  ;;  %493 = vmatpush1.bf16.msra.mxu1 %v4023_v38  ;;  %v4117_v38 = vld [vmem:[#allocation4 + $0x168] ss:$16 sps:$4 sm:$0xff]  }
  0x7f   :  { %522 = vmatpush1.bf16.msra.mxu0 %v4024_v31  ;;  %553 = vmatprep.mubr.bf16.mxu0 %v4691_v0  ;;  %v4099_v31 = vld [vmem:[#allocation4 + $0x108] ss:$16 sps:$4 sm:$0xff]  }
  0x80   :  { %523 = vmatprep.subr.bf16.mxu0 %v4029_v33  ;;  %1756 = vmatprep.subr.bf16.mxu1 %v4050_v41  ;;  %v4107_v33 = vld [vmem:[#allocation4 + $0x12c] ss:$16 sps:$4 sm:$0xff]  }
  0x81   :  { %511 = vmatmul.mubr.bf16.vlgmr.msra.gmra.mrb[0].mxu1 %v4817_v29  ;;  %v4131_v41 = vld [vmem:[#allocation4 + $0x1ac] ss:$16 sps:$4 sm:$0xff]  }
  0x82   :  { %1757 = vmatpush1.bf16.msra.mxu1 %v4048_v43  ;;  %v4134_v43 = vld [vmem:[#allocation4 + $0x1c4] ss:$16 sps:$4 sm:$0xff]  }
  0x83   :  { %524 = vmatpush1.bf16.msra.mxu0 %v4027_v35  ;;  %1758 = vmatprep.subr.bf16.mxu1 %v4056_v45  ;;  %v4113_v35 = vld [vmem:[#allocation4 + $0x14c] ss:$16 sps:$4 sm:$0xff]   ;;  %v4132_v45 = vld [vmem:[#allocation4 + $0x1c0] ss:$16 sps:$4 sm:$0xff]  }
  0x84   :  { %525 = vmatprep.subr.bf16.mxu0 %v4032_v37  ;;  %v4119_v37 = vld [vmem:[#allocation4 + $0x16c] ss:$16 sps:$4 sm:$0xff]  }
  0x86   :  { %1759 = vmatpush1.bf16.msra.mxu1 %v4054_v47  ;;  %v4140_v47 = vld [vmem:[#allocation4 + $0x1e4] ss:$16 sps:$4 sm:$0xff]  }
  0x87   :  { %526 = vmatpush1.bf16.msra.mxu0 %v4030_v39  ;;  %1760 = vmatprep.subr.bf16.mxu1 %v4062_v49  ;;  %v4125_v39 = vld [vmem:[#allocation4 + $0x18c] ss:$16 sps:$4 sm:$0xff]   ;;  %v4138_v49 = vld [vmem:[#allocation4 + $0x1e0] ss:$16 sps:$4 sm:$0xff]  }
  0x88   :  { %527 = vmatprep.subr.bf16.mxu0 %v4035_v40  ;;  %v4123_v40 = vld [vmem:[#allocation4 + $0x188] ss:$16 sps:$4 sm:$0xff]  }
  0x8a   :  { %1761 = vmatpush1.bf16.msra.mxu1 %v4060_v51  ;;  %v4146_v51 = vld [vmem:[#allocation4 + $0x204] ss:$16 sps:$4 sm:$0xff]  }
  0x8b   :  { %528 = vmatpush1.bf16.msra.mxu0 %v4033_v42  ;;  %1762 = vmatprep.subr.bf16.mxu1 %v4068_v53  ;;  %v4129_v42 = vld [vmem:[#allocation4 + $0x1a8] ss:$16 sps:$4 sm:$0xff]   ;;  %v159_v53 = vlaneseq }
  0x8c   :  { %529 = vmatprep.subr.bf16.mxu0 %v4038_v44  ;;  %v4137_v44 = vld [vmem:[#allocation4 + $0x1cc] ss:$16 sps:$4 sm:$0xff]  }
  0x8e   :  { %1763 = vmatpush1.bf16.msra.mxu1 %v4066_v55 }
  0x8f   :  { %530 = vmatpush1.bf16.msra.mxu0 %v4036_v46  ;;  %1764 = vmatprep.subr.bf16.mxu1 %v4074_v57  ;;  %v4135_v46 = vld [vmem:[#allocation4 + $0x1c8] ss:$16 sps:$4 sm:$0xff]  }
  0x90   :  { %531 = vmatprep.subr.bf16.mxu0 %v4041_v48  ;;  %v4143_v48 = vld [vmem:[#allocation4 + $0x1ec] ss:$16 sps:$4 sm:$0xff]  }
  0x92   :  { %1765 = vmatpush1.bf16.msra.mxu1 %v4072_v59 }
  0x93   :  { %532 = vmatpush1.bf16.msra.mxu0 %v4039_v50  ;;  %1766 = vmatprep.subr.bf16.mxu1 %v4080_v61  ;;  %v4141_v50 = vld [vmem:[#allocation4 + $0x1e8] ss:$16 sps:$4 sm:$0xff]  }
  0x94   :  { %533 = vmatprep.subr.bf16.mxu0 %v4044_v52  ;;  %v4149_v52 = vld [vmem:[#allocation4 + $0x20c] ss:$16 sps:$4 sm:$0xff]  }
  0x96   :  { %1767 = vmatpush1.bf16.msra.mxu1 %v4078_v63 }
  0x97   :  { %534 = vmatpush1.bf16.msra.mxu0 %v4042_v54  ;;  %1768 = vmatprep.subr.bf16.mxu1 %v4086_v2  ;;  %v4823_v54 = vshrl.u32 %v159_v53, 7  ;;  %v4182_v53 = vld [vmem:[#allocation4 + $0x2c4] ss:$16 sps:$4 sm:$0xff]  }
  0x98   :  { %535 = vmatprep.subr.bf16.mxu0 %v4047_v56  ;;  %v4831_v56 = vld [vmem:[%s4900_s2] sm:$0x3f] }
  0x99   :  { %v4826_v55 = vsub.s32 0, %v4823_v54  ;;  %v4834_v57 = vsub.s32 1, %v4823_v54 }
  0x9a   :  { %1769 = vmatpush1.bf16.msra.mxu1 %v4084_v4 }
  0x9b   :  { %536 = vmatpush1.bf16.msra.mxu0 %v4045_v58  ;;  %1770 = vmatprep.subr.bf16.mxu1 %v4092_v6  ;;  %v162_v58 = vrot.slane %v4831_v56, %v4826_v55  ;;  %v166_v59 = vrot.slane %v4831_v56, %v4834_v57 }
  0x9c   :  { %1885 = vmatprep.subr.bf16.mxu0 %v4053_v60 }
  0x9e   :  { %554 = vmatmul.mubr.bf16.vlgmr.msra.gmra.mrb[4].mxu0 %v4817_v29  ;;  %1771 = vmatpush1.bf16.msra.mxu1 %v4090_v9  ;;  %v4101_v29 = vld [vmem:[#allocation4 + $0x10c] ss:$16 sps:$4 sm:$0xff]  }
  0x9f   :  { %1886 = vmatpush1.bf16.msra.mxu0 %v4051_v62  ;;  %1772 = vmatprep.subr.bf16.mxu1 %v4098_v10  ;;  %v173_v10 = vsub.s32 3, %v4823_v54 }
  0xa0   :  { %1887 = vmatprep.subr.bf16.mxu0 %v4059_v1 }
  0xa2   :  { %1773 = vmatpush1.bf16.msra.mxu1 %v4096_v12 }
  0xa3   :  { %1888 = vmatpush1.bf16.msra.mxu0 %v4057_v3  ;;  %1774 = vmatprep.subr.bf16.mxu1 %v4104_v14  ;;  %v4147_v14 = vld [vmem:[#allocation4 + $0x208] ss:$16 sps:$4 sm:$0xff]  }
  0xa4   :  { %1889 = vmatprep.subr.bf16.mxu0 %v4065_v5 }
  0xa6   :  { %1775 = vmatpush1.bf16.msra.mxu1 %v4102_v16  ;;  %v4155_v16 = vld [vmem:[#allocation4 + $0x22c] ss:$16 sps:$4 sm:$0xff]  }
  0xa7   :  { %1890 = vmatpush1.bf16.msra.mxu0 %v4063_v7  ;;  %1776 = vmatprep.subr.bf16.mxu1 %v4110_v18  ;;  %v4841_v7 = vsub.s32 2, %v4823_v54  ;;  %v174_v18 = vrot.slane %v4831_v56, %v173_v10 }
  0xa8   :  { %1891 = vmatprep.subr.bf16.mxu0 %v4071_v8 }
  0xaa   :  { %1777 = vmatpush1.bf16.msra.mxu1 %v4108_v20  ;;  %v4153_v20 = vld [vmem:[#allocation4 + $0x228] ss:$16 sps:$4 sm:$0xff]  }
  0xab   :  { %1892 = vmatpush1.bf16.msra.mxu0 %v4069_v11  ;;  %1778 = vmatprep.subr.bf16.mxu1 %v4116_v22  ;;  %v4158_v22 = vld [vmem:[#allocation4 + $0x244] ss:$16 sps:$4 sm:$0xff]  }
  0xac   :  { %1893 = vmatprep.subr.bf16.mxu0 %v4077_v13  ;;  %v4144_v13 = vld [vmem:[#allocation4 + $0x200] ss:$16 sps:$4 sm:$0xff]  }
  0xae   :  { %1779 = vmatpush1.bf16.msra.mxu1 %v4114_v24 }
  0xaf   :  { %1894 = vmatpush1.bf16.msra.mxu0 %v4075_v15  ;;  %1780 = vmatprep.subr.bf16.mxu1 %v4122_v26  ;;  %v4152_v15 = vld [vmem:[#allocation4 + $0x224] ss:$16 sps:$4 sm:$0xff]  }
  0xb0   :  { %1895 = vmatprep.subr.bf16.mxu0 %v4083_v17  ;;  %v170_v17 = vrot.slane %v4831_v56, %v4841_v7 }
  0xb2   :  { %1781 = vmatpush1.bf16.msra.mxu1 %v4120_v28 }
  0xb3   :  { %1896 = vmatpush1.bf16.msra.mxu0 %v4081_v19  ;;  %1782 = vmatprep.subr.bf16.mxu1 %v4128_v30  ;;  %v4150_v19 = vld [vmem:[#allocation4 + $0x220] ss:$16 sps:$4 sm:$0xff]  }
  0xb4   :  { %1897 = vmatprep.subr.bf16.mxu0 %v4089_v21 }
  0xb6   :  { %1783 = vmatpush1.bf16.msra.mxu1 %v4126_v32  ;;  %v4159_v32 = vld [vmem:[#allocation4 + $0x248] ss:$16 sps:$4 sm:$0xff]  }
  0xb7   :  { %1898 = vmatpush1.bf16.msra.mxu0 %v4087_v23  ;;  %1784 = vmatprep.subr.bf16.mxu1 %v4134_v43  ;;  %v4161_v23 = vld [vmem:[#allocation4 + $0x24c] ss:$16 sps:$4 sm:$0xff]   ;;  %v4170_v43 = vld [vmem:[#allocation4 + $0x284] ss:$16 sps:$4 sm:$0xff]  }
  0xb8   :  { %1899 = vmatprep.subr.bf16.mxu0 %v4095_v25 }
  0xba   :  { %1785 = vmatpush1.bf16.msra.mxu1 %v4132_v45  ;;  %v4168_v45 = vld [vmem:[#allocation4 + $0x280] ss:$16 sps:$4 sm:$0xff]  }
  0xbb   :  { %1900 = vmatpush1.bf16.msra.mxu0 %v4093_v27  ;;  %1786 = vmatprep.subr.bf16.mxu1 %v4140_v47  ;;  %v4176_v47 = vld [vmem:[#allocation4 + $0x2a4] ss:$16 sps:$4 sm:$0xff]  }
  0xbc   :  { %1901 = vmatprep.subr.bf16.mxu0 %v4101_v29 }
  0xbe   :  { %1787 = vmatpush1.bf16.msra.mxu1 %v4138_v49  ;;  %v177_v49 = vsub.s32 4, %v4823_v54 }
  0xbf   :  { %1902 = vmatpush1.bf16.msra.mxu0 %v4099_v31  ;;  %1799 = vmatprep.subr.bf16.mxu1 %v4146_v51  ;;  %v4156_v31 = vld [vmem:[#allocation4 + $0x240] ss:$16 sps:$4 sm:$0xff]  }
  0xc0   :  { %1903 = vmatprep.subr.bf16.mxu0 %v4107_v33  ;;  %v4174_v51 = vld [vmem:[#allocation4 + $0x2a0] ss:$16 sps:$4 sm:$0xff]  }
  0xc3   :  { %1904 = vmatpush1.bf16.msra.mxu0 %v4105_v34 }
  0xc4   :  { %1905 = vmatprep.subr.bf16.mxu0 %v4113_v35  ;;  %v4164_v35 = vld [vmem:[#allocation4 + $0x264] ss:$16 sps:$4 sm:$0xff]  }
  0xc7   :  { %1906 = vmatpush1.bf16.msra.mxu0 %v4111_v36  ;;  %v4167_v36 = vld [vmem:[#allocation4 + $0x26c] ss:$16 sps:$4 sm:$0xff]  }
  0xc8   :  { %1907 = vmatprep.subr.bf16.mxu0 %v4119_v37 }
  0xcb   :  { %1908 = vmatpush1.bf16.msra.mxu0 %v4117_v38 }
  0xcc   :  { %1909 = vmatprep.subr.bf16.mxu0 %v4125_v39 }
  0xcf   :  { %1910 = vmatpush1.bf16.msra.mxu0 %v4123_v40  ;;  %v4162_v40 = vld [vmem:[#allocation4 + $0x260] ss:$16 sps:$4 sm:$0xff]  }
  0xd0   :  { %1911 = vmatprep.subr.bf16.mxu0 %v4131_v41  ;;  %v4165_v41 = vld [vmem:[#allocation4 + $0x268] ss:$16 sps:$4 sm:$0xff]  }
  0xd3   :  { %1912 = vmatpush1.bf16.msra.mxu0 %v4129_v42 }
  0xd4   :  { %1913 = vmatprep.subr.bf16.mxu0 %v4137_v44  ;;  %v4173_v44 = vld [vmem:[#allocation4 + $0x28c] ss:$16 sps:$4 sm:$0xff]  }
  0xd7   :  { %1914 = vmatpush1.bf16.msra.mxu0 %v4135_v46  ;;  %v4171_v46 = vld [vmem:[#allocation4 + $0x288] ss:$16 sps:$4 sm:$0xff]  }
  0xd8   :  { %1915 = vmatprep.subr.bf16.mxu0 %v4143_v48  ;;  %v4179_v48 = vld [vmem:[#allocation4 + $0x2ac] ss:$16 sps:$4 sm:$0xff]  }
  0xdb   :  { %1916 = vmatpush1.bf16.msra.mxu0 %v4141_v50  ;;  %v181_v50 = vsub.s32 5, %v4823_v54 }
  0xdc   :  { %1928 = vmatprep.subr.bf16.mxu0 %v4149_v52  ;;  %v4177_v52 = vld [vmem:[#allocation4 + $0x2a8] ss:$16 sps:$4 sm:$0xff]  }
 0x151   :  { %v469_v60 = vpop.f32.mrb[0].mxu0 }
 0x152   :  { %v470_v61 = vadd.f32 %v469_v60, %v162_v58  ;;  %v471_v62 = vpop.f32.mrb[1].mxu0  ;;  %v182_v60 = vrot.slane %v4831_v56, %v181_v50  ;;  %v4234_v50 = vld [vmem:[#allocation4 + $0x3e0] ss:$16 sps:$4 sm:$0xff]  }
 0x153   :  { %v472_v63 = vadd.f32 %v471_v62, %v166_v59  ;;  %v473_v1 = vpop.f32.mrb[2].mxu0  ;;  %v4183_v62 = vld [vmem:[#allocation4 + $0x2c8] ss:$16 sps:$4 sm:$0xff]  }
 0x154   :  { %v474_v2 = vadd.f32 %v473_v1, %v162_v58  ;;  %v475_v3 = vpop.f32.mrb[3].mxu0  ;;  %v564_v5 = vmax.f32 %v470_v61, 0.0  ;;  %v512_v21 = vpop.f32.mrb[0].mxu1  ;;  %v4185_v58 = vld [vmem:[#allocation4 + $0x2cc] ss:$16 sps:$4 sm:$0xff]  }
 0x155   :  { %v476_v4 = vadd.f32 %v475_v3, %v166_v59  ;;  %v565_v8 = vmax.f32 %v472_v63, 0.0  ;;  %v513_v24 = vadd.f32 %v512_v21, %v170_v17  ;;  %v514_v25 = vpop.f32.mrb[1].mxu1  ;;  %v178_v59 = vrot.slane %v4831_v56, %v177_v49  ;;  %v4180_v61 = vld [vmem:[#allocation4 + $0x2c0] ss:$16 sps:$4 sm:$0xff]   ;;  %v4188_v1 = vld [vmem:[#allocation4 + $0x2e4] ss:$16 sps:$4 sm:$0xff]  }
 0x156   :  { %v570_v6 = vmax.f32 %v474_v2, 0.0  ;;  %v515_v26 = vadd.f32 %v514_v25, %v174_v18  ;;  %v516_v27 = vpop.f32.mrb[2].mxu1  ;;  %v4191_v2 = vld [vmem:[#allocation4 + $0x2ec] ss:$16 sps:$4 sm:$0xff]   ;;  %v4189_v56 = vld [vmem:[#allocation4 + $0x2e8] ss:$16 sps:$4 sm:$0xff]  }
 0x157   :  { %v571_v9 = vmax.f32 %v476_v4, 0.0  ;;  %v566_v28 = vmax.f32 %v513_v24, 0.0  ;;  %v517_v29 = vadd.f32 %v516_v27, %v170_v17  ;;  %v518_v30 = vpop.f32.mrb[3].mxu1  ;;  %v4195_v21 = vld [vmem:[#allocation4 + $0x308] ss:$16 sps:$4 sm:$0xff]  }
 0x158   :  { %v576_v11 = vpack.c.bf16 %v570_v6, %v564_v5  ;;  %v567_v33 = vmax.f32 %v515_v26, 0.0  ;;  %v519_v34 = vadd.f32 %v518_v30, %v174_v18  ;;  %v4203_v24 = vld [vmem:[#allocation4 + $0x32c] ss:$16 sps:$4 sm:$0xff]   ;;  %v4198_v25 = vld [vmem:[#allocation4 + $0x320] ss:$16 sps:$4 sm:$0xff]  }
 0x159   :  { %v577_v12 = vpack.c.bf16 %v571_v9, %v565_v8  ;;  %v572_v37 = vmax.f32 %v517_v29, 0.0  ;;  %v4201_v26 = vld [vmem:[#allocation4 + $0x328] ss:$16 sps:$4 sm:$0xff]   ;;  %v4206_v27 = vld [vmem:[#allocation4 + $0x344] ss:$16 sps:$4 sm:$0xff]  }
 0x15a   :  { %v573_v38 = vmax.f32 %v519_v34, 0.0  ;;  %v4204_v29 = vld [vmem:[#allocation4 + $0x340] ss:$16 sps:$4 sm:$0xff]   ;;  %v4207_v30 = vld [vmem:[#allocation4 + $0x348] ss:$16 sps:$4 sm:$0xff]  }
 0x15b   :  { %1788 = vmatprep.mubr.bf16.mxu1 %v577_v12  ;;  %1917 = vmatprep.mubr.bf16.mxu0 %v577_v12  ;;  %v4849_v39 = vpack.c.bf16 %v572_v37, %v566_v28  ;;  %v4186_v12 = vld [vmem:[#allocation4 + $0x2e0] ss:$16 sps:$4 sm:$0xff]   ;;  %v4209_v28 = vld [vmem:[#allocation4 + $0x34c] ss:$16 sps:$4 sm:$0xff]   ;;  %v4213_v34 = vld [vmem:[#allocation4 + $0x368] ss:$16 sps:$4 sm:$0xff]  }
 0x15c   :  { %1789 = vmatmul.mubr.bf16.vlgmr.msra.gmra.mrb[4].mxu1 %v576_v11  ;;  %1918 = vmatmul.mubr.bf16.vlgmr.msra.gmra.mrb[8].mxu0 %v576_v11  ;;  %v579_v42 = vpack.c.bf16 %v573_v38, %v567_v33  ;;  %v4210_v33 = vld [vmem:[#allocation4 + $0x360] ss:$16 sps:$4 sm:$0xff]   ;;  %v4219_v38 = vld [vmem:[#allocation4 + $0x388] ss:$16 sps:$4 sm:$0xff]   ;;  %v4239_v49 = vld [vmem:[#allocation4 + $0x3ec] ss:$16 sps:$4 sm:$0xff]  }
 0x15d   :  { %1800 = vmatpush1.bf16.msra.mxu1 %v4144_v13  ;;  %1929 = vmatpush1.bf16.msra.mxu0 %v4147_v14  ;;  %v4216_v37 = vld [vmem:[#allocation4 + $0x380] ss:$16 sps:$4 sm:$0xff]  }
 0x15e   :  { %1801 = vmatprep.subr.bf16.mxu1 %v4152_v15  ;;  %1930 = vmatprep.subr.bf16.mxu0 %v4155_v16  ;;  %v4194_v15 = vld [vmem:[#allocation4 + $0x304] ss:$16 sps:$4 sm:$0xff]   ;;  %v4197_v16 = vld [vmem:[#allocation4 + $0x30c] ss:$16 sps:$4 sm:$0xff]  }
 0x15f   :  { %1831 = vmatprep.mubr.bf16.mxu1 %v579_v42  ;;  %1960 = vmatprep.mubr.bf16.mxu0 %v579_v42  ;;  %v4222_v42 = vld [vmem:[#allocation4 + $0x3a0] ss:$16 sps:$4 sm:$0xff]  }
 0x161   :  { %1802 = vmatpush1.bf16.msra.mxu1 %v4150_v19  ;;  %1931 = vmatpush1.bf16.msra.mxu0 %v4153_v20  ;;  %v4192_v20 = vld [vmem:[#allocation4 + $0x300] ss:$16 sps:$4 sm:$0xff]  }
 0x162   :  { %1803 = vmatprep.subr.bf16.mxu1 %v4158_v22  ;;  %1932 = vmatprep.subr.bf16.mxu0 %v4161_v23  ;;  %v4200_v23 = vld [vmem:[#allocation4 + $0x324] ss:$16 sps:$4 sm:$0xff]  }
 0x165   :  { %1804 = vmatpush1.bf16.msra.mxu1 %v4156_v31  ;;  %1933 = vmatpush1.bf16.msra.mxu0 %v4159_v32  ;;  %v4212_v31 = vld [vmem:[#allocation4 + $0x364] ss:$16 sps:$4 sm:$0xff]   ;;  %v4215_v32 = vld [vmem:[#allocation4 + $0x36c] ss:$16 sps:$4 sm:$0xff]  }
 0x166   :  { %1805 = vmatprep.subr.bf16.mxu1 %v4164_v35  ;;  %1934 = vmatprep.subr.bf16.mxu0 %v4167_v36  ;;  %v4218_v35 = vld [vmem:[#allocation4 + $0x384] ss:$16 sps:$4 sm:$0xff]   ;;  %v4221_v36 = vld [vmem:[#allocation4 + $0x38c] ss:$16 sps:$4 sm:$0xff]  }
 0x169   :  { %1806 = vmatpush1.bf16.msra.mxu1 %v4162_v40  ;;  %1935 = vmatpush1.bf16.msra.mxu0 %v4165_v41  ;;  %v4224_v40 = vld [vmem:[#allocation4 + $0x3a4] ss:$16 sps:$4 sm:$0xff]   ;;  %v4227_v41 = vld [vmem:[#allocation4 + $0x3ac] ss:$16 sps:$4 sm:$0xff]  }
 0x16a   :  { %1807 = vmatprep.subr.bf16.mxu1 %v4170_v43  ;;  %1936 = vmatprep.subr.bf16.mxu0 %v4173_v44  ;;  %v4225_v43 = vld [vmem:[#allocation4 + $0x3a8] ss:$16 sps:$4 sm:$0xff]   ;;  %v4230_v44 = vld [vmem:[#allocation4 + $0x3c4] ss:$16 sps:$4 sm:$0xff]  }
 0x16d   :  { %1808 = vmatpush1.bf16.msra.mxu1 %v4168_v45  ;;  %1937 = vmatpush1.bf16.msra.mxu0 %v4171_v46  ;;  %v4233_v45 = vld [vmem:[#allocation4 + $0x3cc] ss:$16 sps:$4 sm:$0xff]   ;;  %v4228_v46 = vld [vmem:[#allocation4 + $0x3c0] ss:$16 sps:$4 sm:$0xff]  }
 0x16e   :  { %1809 = vmatprep.subr.bf16.mxu1 %v4176_v47  ;;  %1938 = vmatprep.subr.bf16.mxu0 %v4179_v48  ;;  %v4231_v47 = vld [vmem:[#allocation4 + $0x3c8] ss:$16 sps:$4 sm:$0xff]   ;;  %v4236_v48 = vld [vmem:[#allocation4 + $0x3e4] ss:$16 sps:$4 sm:$0xff]  }
 0x171   :  { %1810 = vmatpush1.bf16.msra.mxu1 %v4174_v51  ;;  %1939 = vmatpush1.bf16.msra.mxu0 %v4177_v52  ;;  %v555_v63 = vpop.f32.mrb[4].mxu0  ;;  %v4237_v51 = vld [vmem:[#allocation4 + $0x3e8] ss:$16 sps:$4 sm:$0xff]   ;;  %v4242_v52 = vld [vmem:[#allocation4 + $0x404] ss:$16 sps:$4 sm:$0xff]  }
 0x172   :  { %1811 = vmatprep.subr.bf16.mxu1 %v4182_v53  ;;  %1940 = vmatprep.subr.bf16.mxu0 %v4185_v58  ;;  %v556_v3 = vadd.f32 %v555_v63, %v178_v59  ;;  %v557_v4 = vpop.f32.mrb[5].mxu0  ;;  %v4245_v53 = vld [vmem:[#allocation4 + $0x40c] ss:$16 sps:$4 sm:$0xff]   ;;  %v4240_v58 = vld [vmem:[#allocation4 + $0x400] ss:$16 sps:$4 sm:$0xff]  }
 0x173   :  { %v558_v5 = vadd.f32 %v557_v4, %v182_v60  ;;  %v559_v6 = vpop.f32.mrb[6].mxu0  ;;  %v4249_v63 = vld [vmem:[#allocation4 + $0x428] ss:$16 sps:$4 sm:$0xff]  }
 0x174   :  { %v568_v8 = vmax.f32 %v556_v3, 0.0  ;;  %v560_v9 = vadd.f32 %v559_v6, %v178_v59  ;;  %v561_v11 = vpop.f32.mrb[7].mxu0  ;;  %v4243_v59 = vld [vmem:[#allocation4 + $0x408] ss:$16 sps:$4 sm:$0xff]   ;;  %v4252_v3 = vld [vmem:[#allocation4 + $0x440] ss:$16 sps:$4 sm:$0xff]  }
 0x175   :  { %1812 = vmatpush1.bf16.msra.mxu1 %v4180_v61  ;;  %1941 = vmatpush1.bf16.msra.mxu0 %v4183_v62  ;;  %v569_v13 = vmax.f32 %v558_v5, 0.0  ;;  %v562_v14 = vadd.f32 %v561_v11, %v182_v60  ;;  %v4248_v60 = vld [vmem:[#allocation4 + $0x424] ss:$16 sps:$4 sm:$0xff]   ;;  %v4251_v61 = vld [vmem:[#allocation4 + $0x42c] ss:$16 sps:$4 sm:$0xff]  }
 0x176   :  { %1813 = vmatprep.subr.bf16.mxu1 %v4188_v1  ;;  %1942 = vmatprep.subr.bf16.mxu0 %v4191_v2  ;;  %v574_v17 = vmax.f32 %v560_v9, 0.0  ;;  %v4246_v62 = vld [vmem:[#allocation4 + $0x420] ss:$16 sps:$4 sm:$0xff]   ;;  %v4254_v1 = vld [vmem:[#allocation4 + $0x444] ss:$16 sps:$4 sm:$0xff]  }
 0x177   :  { %v575_v18 = vmax.f32 %v562_v14, 0.0  ;;  %v4257_v2 = vld [vmem:[#allocation4 + $0x44c] ss:$16 sps:$4 sm:$0xff]   ;;  %v4255_v4 = vld [vmem:[#allocation4 + $0x448] ss:$16 sps:$4 sm:$0xff]  }
 0x178   :  { %v4855_v19 = vpack.c.bf16 %v574_v17, %v568_v8  ;;  %v4260_v5 = vld [vmem:[#allocation4 + $0x464] ss:$16 sps:$4 sm:$0xff]   ;;  %v4258_v6 = vld [vmem:[#allocation4 + $0x460] ss:$16 sps:$4 sm:$0xff]   ;;  %v4261_v8 = vld [vmem:[#allocation4 + $0x468] ss:$16 sps:$4 sm:$0xff]  }
 0x179   :  { %1814 = vmatpush1.bf16.msra.mxu1 %v4186_v12  ;;  %1943 = vmatpush1.bf16.msra.mxu0 %v4189_v56  ;;  %v4857_v22 = vpack.c.bf16 %v575_v18, %v569_v13  ;;  %v4266_v9 = vld [vmem:[#allocation4 + $0x484] ss:$16 sps:$4 sm:$0xff]   ;;  %v4269_v11 = vld [vmem:[#allocation4 + $0x48c] ss:$16 sps:$4 sm:$0xff]   ;;  %v4264_v12 = vld [vmem:[#allocation4 + $0x480] ss:$16 sps:$4 sm:$0xff]  }
 0x17a   :  { %1815 = vmatprep.subr.bf16.mxu1 %v4194_v15  ;;  %1944 = vmatprep.subr.bf16.mxu0 %v4197_v16  ;;  %v4267_v56 = vld [vmem:[#allocation4 + $0x488] ss:$16 sps:$4 sm:$0xff]   ;;  %v4272_v13 = vld [vmem:[#allocation4 + $0x4a4] ss:$16 sps:$4 sm:$0xff]   ;;  %v4275_v14 = vld [vmem:[#allocation4 + $0x4ac] ss:$16 sps:$4 sm:$0xff]  }
 0x17b   :  { %v4270_v15 = vld [vmem:[#allocation4 + $0x4a0] ss:$16 sps:$4 sm:$0xff]   ;;  %v4273_v16 = vld [vmem:[#allocation4 + $0x4a8] ss:$16 sps:$4 sm:$0xff]   ;;  %v4278_v17 = vld [vmem:[#allocation4 + $0x4c4] ss:$16 sps:$4 sm:$0xff]  }
 0x17c   :  { %v4281_v18 = vld [vmem:[#allocation4 + $0x4cc] ss:$16 sps:$4 sm:$0xff]  }
 0x17d   :  { %1816 = vmatpush1.bf16.msra.mxu1 %v4192_v20  ;;  %1945 = vmatpush1.bf16.msra.mxu0 %v4195_v21  ;;  %v4276_v20 = vld [vmem:[#allocation4 + $0x4c0] ss:$16 sps:$4 sm:$0xff]   ;;  %v4279_v21 = vld [vmem:[#allocation4 + $0x4c8] ss:$16 sps:$4 sm:$0xff]  }
 0x17e   :  { %1817 = vmatprep.subr.bf16.mxu1 %v4200_v23  ;;  %1946 = vmatprep.subr.bf16.mxu0 %v4203_v24  ;;  %v4287_v23 = vld [vmem:[#allocation4 + $0x4ec] ss:$16 sps:$4 sm:$0xff]   ;;  %v4282_v24 = vld [vmem:[#allocation4 + $0x4e0] ss:$16 sps:$4 sm:$0xff]  }
 0x181   :  { %1818 = vmatpush1.bf16.msra.mxu1 %v4198_v25  ;;  %1947 = vmatpush1.bf16.msra.mxu0 %v4201_v26  ;;  %v4285_v25 = vld [vmem:[#allocation4 + $0x4e8] ss:$16 sps:$4 sm:$0xff]   ;;  %v4290_v26 = vld [vmem:[#allocation4 + $0x504] ss:$16 sps:$4 sm:$0xff]  }
 0x182   :  { %1819 = vmatprep.subr.bf16.mxu1 %v4206_v27  ;;  %1948 = vmatprep.subr.bf16.mxu0 %v4209_v28  ;;  %v4293_v27 = vld [vmem:[#allocation4 + $0x50c] ss:$16 sps:$4 sm:$0xff]   ;;  %v4288_v28 = vld [vmem:[#allocation4 + $0x500] ss:$16 sps:$4 sm:$0xff]  }
 0x185   :  { %1820 = vmatpush1.bf16.msra.mxu1 %v4204_v29  ;;  %1949 = vmatpush1.bf16.msra.mxu0 %v4207_v30  ;;  %v4291_v29 = vld [vmem:[#allocation4 + $0x508] ss:$16 sps:$4 sm:$0xff]   ;;  %v4296_v30 = vld [vmem:[#allocation4 + $0x524] ss:$16 sps:$4 sm:$0xff]  }
 0x186   :  { %1821 = vmatprep.subr.bf16.mxu1 %v4212_v31  ;;  %1950 = vmatprep.subr.bf16.mxu0 %v4215_v32  ;;  %v4299_v31 = vld [vmem:[#allocation4 + $0x52c] ss:$16 sps:$4 sm:$0xff]   ;;  %v4294_v32 = vld [vmem:[#allocation4 + $0x520] ss:$16 sps:$4 sm:$0xff]  }
 0x189   :  { %1822 = vmatpush1.bf16.msra.mxu1 %v4210_v33  ;;  %1951 = vmatpush1.bf16.msra.mxu0 %v4213_v34  ;;  %v4297_v33 = vld [vmem:[#allocation4 + $0x528] ss:$16 sps:$4 sm:$0xff]   ;;  %v4302_v34 = vld [vmem:[#allocation4 + $0x544] ss:$16 sps:$4 sm:$0xff]  }
 0x18a   :  { %1823 = vmatprep.subr.bf16.mxu1 %v4218_v35  ;;  %1952 = vmatprep.subr.bf16.mxu0 %v4221_v36  ;;  %v4305_v35 = vld [vmem:[#allocation4 + $0x54c] ss:$16 sps:$4 sm:$0xff]   ;;  %v4300_v36 = vld [vmem:[#allocation4 + $0x540] ss:$16 sps:$4 sm:$0xff]  }
 0x18d   :  { %1824 = vmatpush1.bf16.msra.mxu1 %v4216_v37  ;;  %1953 = vmatpush1.bf16.msra.mxu0 %v4219_v38  ;;  %v4303_v37 = vld [vmem:[#allocation4 + $0x548] ss:$16 sps:$4 sm:$0xff]   ;;  %v4308_v38 = vld [vmem:[#allocation4 + $0x564] ss:$16 sps:$4 sm:$0xff]  }
 0x18e   :  { %1825 = vmatprep.subr.bf16.mxu1 %v4224_v40  ;;  %1954 = vmatprep.subr.bf16.mxu0 %v4227_v41  ;;  %v4311_v40 = vld [vmem:[#allocation4 + $0x56c] ss:$16 sps:$4 sm:$0xff]   ;;  %v4306_v41 = vld [vmem:[#allocation4 + $0x560] ss:$16 sps:$4 sm:$0xff]  }
 0x191   :  { %1826 = vmatpush1.bf16.msra.mxu1 %v4222_v42  ;;  %1955 = vmatpush1.bf16.msra.mxu0 %v4225_v43  ;;  %v4309_v42 = vld [vmem:[#allocation4 + $0x568] ss:$16 sps:$4 sm:$0xff]   ;;  %v4314_v43 = vld [vmem:[#allocation4 + $0x584] ss:$16 sps:$4 sm:$0xff]  }
 0x192   :  { %1827 = vmatprep.subr.bf16.mxu1 %v4230_v44  ;;  %1956 = vmatprep.subr.bf16.mxu0 %v4233_v45  ;;  %v4317_v44 = vld [vmem:[#allocation4 + $0x58c] ss:$16 sps:$4 sm:$0xff]   ;;  %v4312_v45 = vld [vmem:[#allocation4 + $0x580] ss:$16 sps:$4 sm:$0xff]  }
 0x195   :  { %1828 = vmatpush1.bf16.msra.mxu1 %v4228_v46  ;;  %1957 = vmatpush1.bf16.msra.mxu0 %v4231_v47  ;;  %v4315_v46 = vld [vmem:[#allocation4 + $0x588] ss:$16 sps:$4 sm:$0xff]   ;;  %v4320_v47 = vld [vmem:[#allocation4 + $0x5a4] ss:$16 sps:$4 sm:$0xff]  }
 0x196   :  { %1829 = vmatprep.subr.bf16.mxu1 %v4236_v48  ;;  %1958 = vmatprep.subr.bf16.mxu0 %v4239_v49  ;;  %v4323_v48 = vld [vmem:[#allocation4 + $0x5ac] ss:$16 sps:$4 sm:$0xff]   ;;  %v4318_v49 = vld [vmem:[#allocation4 + $0x5a0] ss:$16 sps:$4 sm:$0xff]  }
 0x199   :  { %1830 = vmatpush1.bf16.msra.mxu1 %v4234_v50  ;;  %1959 = vmatpush1.bf16.msra.mxu0 %v4237_v51  ;;  %v4321_v50 = vld [vmem:[#allocation4 + $0x5a8] ss:$16 sps:$4 sm:$0xff]   ;;  %v4326_v51 = vld [vmem:[#allocation4 + $0x5c4] ss:$16 sps:$4 sm:$0xff]  }
 0x19a   :  { %1842 = vmatprep.subr.bf16.mxu1 %v4242_v52  ;;  %1971 = vmatprep.subr.bf16.mxu0 %v4245_v53  ;;  %v4329_v52 = vld [vmem:[#allocation4 + $0x5cc] ss:$16 sps:$4 sm:$0xff]   ;;  %v4324_v53 = vld [vmem:[#allocation4 + $0x5c0] ss:$16 sps:$4 sm:$0xff]  }
 0x19c   :  { %1832 = vmatmul.mubr.bf16.vlgmr.msra.gmra.mrb[4].mxu1 %v4849_v39  ;;  %1961 = vmatmul.mubr.bf16.vlgmr.msra.gmra.mrb[8].mxu0 %v4849_v39  ;;  %v4263_v39 = vld [vmem:[#allocation4 + $0x46c] ss:$16 sps:$4 sm:$0xff]  }
 0x19d   :  { %1843 = vmatpush1.bf16.msra.mxu1 %v4240_v58  ;;  %1972 = vmatpush1.bf16.msra.mxu0 %v4243_v59  ;;  %v4327_v58 = vld [vmem:[#allocation4 + $0x5c8] ss:$16 sps:$4 sm:$0xff]   ;;  %v4332_v59 = vld [vmem:[#allocation4 + $0x5e4] ss:$16 sps:$4 sm:$0xff]  }
 0x19e   :  { %1844 = vmatprep.subr.bf16.mxu1 %v4248_v60  ;;  %1973 = vmatprep.subr.bf16.mxu0 %v4251_v61  ;;  %v4335_v60 = vld [vmem:[#allocation4 + $0x5ec] ss:$16 sps:$4 sm:$0xff]   ;;  %v4330_v61 = vld [vmem:[#allocation4 + $0x5e0] ss:$16 sps:$4 sm:$0xff]  }
 0x19f   :  { %1874 = vmatprep.mubr.bf16.mxu1 %v4857_v22  ;;  %2003 = vmatprep.mubr.bf16.mxu0 %v4857_v22  ;;  %v4284_v22 = vld [vmem:[#allocation4 + $0x4e4] ss:$16 sps:$4 sm:$0xff]  }
 0x1a1   :  { %1845 = vmatpush1.bf16.msra.mxu1 %v4246_v62  ;;  %1974 = vmatpush1.bf16.msra.mxu0 %v4249_v63  ;;  %v4333_v62 = vld [vmem:[#allocation4 + $0x5e8] ss:$16 sps:$4 sm:$0xff]   ;;  %v4338_v63 = vld [vmem:[#allocation6 + $0x4] ss:$12 sps:$4 sm:$0xff]  }
 0x1a2   :  { %1846 = vmatprep.subr.bf16.mxu1 %v4254_v1  ;;  %1975 = vmatprep.subr.bf16.mxu0 %v4257_v2  ;;  %v4363_v1 = vld [vmem:[#allocation6 + $0xc8] ss:$12 sps:$4 sm:$0xff]   ;;  %v4336_v2 = vld [vmem:[#allocation6] ss:$12 sps:$4 sm:$0xff]  }
 0x1a5   :  { %1847 = vmatpush1.bf16.msra.mxu1 %v4252_v3  ;;  %1976 = vmatpush1.bf16.msra.mxu0 %v4255_v4  ;;  %v4364_v3 = vld [vmem:[#allocation6 + $0x8] ss:$12 sps:$4 sm:$0xff]  }
 0x1a6   :  { %1848 = vmatprep.subr.bf16.mxu1 %v4260_v5  ;;  %1977 = vmatprep.subr.bf16.mxu0 %v4263_v39  ;;  %v4341_v4 = vld [vmem:[#allocation6 + $0x1c] ss:$12 sps:$4 sm:$0xff]   ;;  %v4368_v5 = vld [vmem:[#allocation6 + $0xe0] ss:$12 sps:$4 sm:$0xff]   ;;  %v4339_v39 = vld [vmem:[#allocation6 + $0x18] ss:$12 sps:$4 sm:$0xff]  }
 0x1a9   :  { %1849 = vmatpush1.bf16.msra.mxu1 %v4258_v6  ;;  %1978 = vmatpush1.bf16.msra.mxu0 %v4261_v8  ;;  %v4369_v6 = vld [vmem:[#allocation6 + $0x20] ss:$12 sps:$4 sm:$0xff]  }
 0x1aa   :  { %1850 = vmatprep.subr.bf16.mxu1 %v4266_v9  ;;  %1979 = vmatprep.subr.bf16.mxu0 %v4269_v11  ;;  %v4344_v8 = vld [vmem:[#allocation6 + $0x34] ss:$12 sps:$4 sm:$0xff]   ;;  %v4373_v9 = vld [vmem:[#allocation6 + $0xf8] ss:$12 sps:$4 sm:$0xff]   ;;  %v4342_v11 = vld [vmem:[#allocation6 + $0x30] ss:$12 sps:$4 sm:$0xff]  }
 0x1ad   :  { %1851 = vmatpush1.bf16.msra.mxu1 %v4264_v12  ;;  %1980 = vmatpush1.bf16.msra.mxu0 %v4267_v56  ;;  %v4374_v12 = vld [vmem:[#allocation6 + $0x38] ss:$12 sps:$4 sm:$0xff]  }
 0x1ae   :  { %1852 = vmatprep.subr.bf16.mxu1 %v4272_v13  ;;  %1981 = vmatprep.subr.bf16.mxu0 %v4275_v14  ;;  %v4347_v56 = vld [vmem:[#allocation6 + $0x4c] ss:$12 sps:$4 sm:$0xff]   ;;  %v4378_v13 = vld [vmem:[#allocation6 + $0x110] ss:$12 sps:$4 sm:$0xff]   ;;  %v4345_v14 = vld [vmem:[#allocation6 + $0x48] ss:$12 sps:$4 sm:$0xff]  }
 0x1b1   :  { %1853 = vmatpush1.bf16.msra.mxu1 %v4270_v15  ;;  %1982 = vmatpush1.bf16.msra.mxu0 %v4273_v16  ;;  %v4350_v15 = vld [vmem:[#allocation6 + $0x64] ss:$12 sps:$4 sm:$0xff]   ;;  %v4383_v16 = vld [vmem:[#allocation6 + $0x128] ss:$12 sps:$4 sm:$0xff]  }
 0x1b2   :  { %1854 = vmatprep.subr.bf16.mxu1 %v4278_v17  ;;  %1983 = vmatprep.subr.bf16.mxu0 %v4281_v18  ;;  %v4348_v17 = vld [vmem:[#allocation6 + $0x60] ss:$12 sps:$4 sm:$0xff]   ;;  %v4384_v18 = vld [vmem:[#allocation6 + $0x68] ss:$12 sps:$4 sm:$0xff]  }
 0x1b5   :  { %1855 = vmatpush1.bf16.msra.mxu1 %v4276_v20  ;;  %1984 = vmatpush1.bf16.msra.mxu0 %v4279_v21  ;;  %v4353_v20 = vld [vmem:[#allocation6 + $0x7c] ss:$12 sps:$4 sm:$0xff]   ;;  %v4388_v21 = vld [vmem:[#allocation6 + $0x140] ss:$12 sps:$4 sm:$0xff]  }
 0x1b6   :  { %1856 = vmatprep.subr.bf16.mxu1 %v4284_v22  ;;  %1985 = vmatprep.subr.bf16.mxu0 %v4287_v23  ;;  %v4351_v22 = vld [vmem:[#allocation6 + $0x78] ss:$12 sps:$4 sm:$0xff]   ;;  %v4389_v23 = vld [vmem:[#allocation6 + $0x80] ss:$12 sps:$4 sm:$0xff]  }
 0x1b9   :  { %1857 = vmatpush1.bf16.msra.mxu1 %v4282_v24  ;;  %1986 = vmatpush1.bf16.msra.mxu0 %v4285_v25  ;;  %v4356_v24 = vld [vmem:[#allocation6 + $0x94] ss:$12 sps:$4 sm:$0xff]   ;;  %v4354_v25 = vld [vmem:[#allocation6 + $0x90] ss:$12 sps:$4 sm:$0xff]  }
 0x1ba   :  { %1858 = vmatprep.subr.bf16.mxu1 %v4290_v26  ;;  %1987 = vmatprep.subr.bf16.mxu0 %v4293_v27  ;;  %v4359_v26 = vld [vmem:[#allocation6 + $0xac] ss:$12 sps:$4 sm:$0xff]   ;;  %v4357_v27 = vld [vmem:[#allocation6 + $0xa8] ss:$12 sps:$4 sm:$0xff]  }
 0x1bd   :  { %1859 = vmatpush1.bf16.msra.mxu1 %v4288_v28  ;;  %1988 = vmatpush1.bf16.msra.mxu0 %v4291_v29  ;;  %v4362_v28 = vld [vmem:[#allocation6 + $0xc4] ss:$12 sps:$4 sm:$0xff]   ;;  %v4360_v29 = vld [vmem:[#allocation6 + $0xc0] ss:$12 sps:$4 sm:$0xff]  }
 0x1be   :  { %1860 = vmatprep.subr.bf16.mxu1 %v4296_v30  ;;  %1989 = vmatprep.subr.bf16.mxu0 %v4299_v31  ;;  %v4367_v30 = vld [vmem:[#allocation6 + $0xdc] ss:$12 sps:$4 sm:$0xff]   ;;  %v4365_v31 = vld [vmem:[#allocation6 + $0xd8] ss:$12 sps:$4 sm:$0xff]  }
 0x1c1   :  { %1861 = vmatpush1.bf16.msra.mxu1 %v4294_v32  ;;  %1990 = vmatpush1.bf16.msra.mxu0 %v4297_v33  ;;  %v4372_v32 = vld [vmem:[#allocation6 + $0xf4] ss:$12 sps:$4 sm:$0xff]   ;;  %v4370_v33 = vld [vmem:[#allocation6 + $0xf0] ss:$12 sps:$4 sm:$0xff]  }
 0x1c2   :  { %1862 = vmatprep.subr.bf16.mxu1 %v4302_v34  ;;  %1991 = vmatprep.subr.bf16.mxu0 %v4305_v35  ;;  %v4377_v34 = vld [vmem:[#allocation6 + $0x10c] ss:$12 sps:$4 sm:$0xff]   ;;  %v4375_v35 = vld [vmem:[#allocation6 + $0x108] ss:$12 sps:$4 sm:$0xff]  }
 0x1c5   :  { %1863 = vmatpush1.bf16.msra.mxu1 %v4300_v36  ;;  %1992 = vmatpush1.bf16.msra.mxu0 %v4303_v37  ;;  %v4382_v36 = vld [vmem:[#allocation6 + $0x124] ss:$12 sps:$4 sm:$0xff]   ;;  %v4380_v37 = vld [vmem:[#allocation6 + $0x120] ss:$12 sps:$4 sm:$0xff]  }
 0x1c6   :  { %1864 = vmatprep.subr.bf16.mxu1 %v4308_v38  ;;  %1993 = vmatprep.subr.bf16.mxu0 %v4311_v40  ;;  %v4387_v38 = vld [vmem:[#allocation6 + $0x13c] ss:$12 sps:$4 sm:$0xff]   ;;  %v4385_v40 = vld [vmem:[#allocation6 + $0x138] ss:$12 sps:$4 sm:$0xff]  }
 0x1c9   :  { %1865 = vmatpush1.bf16.msra.mxu1 %v4306_v41  ;;  %1994 = vmatpush1.bf16.msra.mxu0 %v4309_v42  ;;  %v4392_v41 = vld [vmem:[#allocation6 + $0x154] ss:$12 sps:$4 sm:$0xff]   ;;  %v4393_v42 = vld [vmem:[#allocation6 + $0x158] ss:$12 sps:$4 sm:$0xff]  }
 0x1ca   :  { %1866 = vmatprep.subr.bf16.mxu1 %v4314_v43  ;;  %1995 = vmatprep.subr.bf16.mxu0 %v4317_v44  ;;  %v4390_v43 = vld [vmem:[#allocation6 + $0x150] ss:$12 sps:$4 sm:$0xff]   ;;  %v4394_v44 = vld [vmem:[#allocation6 + $0x98] ss:$12 sps:$4 sm:$0xff]  }
 0x1cd   :  { %1867 = vmatpush1.bf16.msra.mxu1 %v4312_v45  ;;  %1996 = vmatpush1.bf16.msra.mxu0 %v4315_v46  ;;  %v4397_v45 = vld [vmem:[#allocation6 + $0x16c] ss:$12 sps:$4 sm:$0xff]   ;;  %v4398_v46 = vld [vmem:[#allocation6 + $0x170] ss:$12 sps:$4 sm:$0xff]  }
 0x1ce   :  { %1868 = vmatprep.subr.bf16.mxu1 %v4320_v47  ;;  %1997 = vmatprep.subr.bf16.mxu0 %v4323_v48  ;;  %v4395_v47 = vld [vmem:[#allocation6 + $0x168] ss:$12 sps:$4 sm:$0xff]   ;;  %v4399_v48 = vld [vmem:[#allocation6 + $0xb0] ss:$12 sps:$4 sm:$0xff]  }
 0x1d1   :  { %1869 = vmatpush1.bf16.msra.mxu1 %v4318_v49  ;;  %1998 = vmatpush1.bf16.msra.mxu0 %v4321_v50  ;;  %v4402_v49 = vld [vmem:[#allocation6 + $0x184] ss:$12 sps:$4 sm:$0xff]   ;;  %v4403_v50 = vld [vmem:[#allocation6 + $0x248] ss:$12 sps:$4 sm:$0xff]  }
 0x1d2   :  { %1870 = vmatprep.subr.bf16.mxu1 %v4326_v51  ;;  %1999 = vmatprep.subr.bf16.mxu0 %v4329_v52  ;;  %v774_v51 = vld [vmem:[%s4902_s4] sm:$0xf] }
 0x1d3   :  { %v779_v52 = vrot.slane %v774_v51, %v4826_v55 }
 0x1d5   :  { %1871 = vmatpush1.bf16.msra.mxu1 %v4324_v53  ;;  %2000 = vmatpush1.bf16.msra.mxu0 %v4327_v58  ;;  %v787_v53 = vrot.slane %v774_v51, %v4841_v7  ;;  %v783_v58 = vrot.slane %v774_v51, %v4834_v57 }
 0x1d6   :  { %1872 = vmatprep.subr.bf16.mxu1 %v4332_v59  ;;  %2001 = vmatprep.subr.bf16.mxu0 %v4335_v60  ;;  %v791_v59 = vrot.slane %v774_v51, %v173_v10  ;;  %v4438_v51 = vld [vmem:[#allocation6 + $0x2f0] ss:$12 sps:$4 sm:$0xff]  }
 0x1d9   :  { %1873 = vmatpush1.bf16.msra.mxu1 %v4330_v61  ;;  %2002 = vmatpush1.bf16.msra.mxu0 %v4333_v62 }
 0x1da   :  { %2683 = vmatprep.subr.bf16.mxu1 %v4338_v63  ;;  %3853 = vmatprep.subr.bf16.mxu0 %v4363_v1 }
 0x1dc   :  { %1875 = vmatmul.mubr.bf16.vlgmr.msra.gmra.mrb[4].mxu1 %v4855_v19  ;;  %2004 = vmatmul.mubr.bf16.vlgmr.msra.gmra.mrb[8].mxu0 %v4855_v19  ;;  %v4379_v19 = vld [vmem:[#allocation6 + $0x50] ss:$12 sps:$4 sm:$0xff]  }
 0x1dd   :  { %2684 = vmatpush1.bf16.msra.mxu1 %v4336_v2  ;;  %3854 = vmatpush3.bf16.msra.mxu0 %v4364_v3 }
 0x1de   :  { %2685 = vmatprep.subr.bf16.mxu1 %v4341_v4  ;;  %3855 = vmatprep.subr.bf16.mxu0 %v4368_v5 }
 0x1e1   :  { %2686 = vmatpush1.bf16.msra.mxu1 %v4339_v39  ;;  %3856 = vmatpush3.bf16.msra.mxu0 %v4369_v6 }
 0x1e2   :  { %2687 = vmatprep.subr.bf16.mxu1 %v4344_v8  ;;  %3857 = vmatprep.subr.bf16.mxu0 %v4373_v9 }
 0x1e5   :  { %2688 = vmatpush1.bf16.msra.mxu1 %v4342_v11  ;;  %3858 = vmatpush3.bf16.msra.mxu0 %v4374_v12 }
 0x1e6   :  { %2689 = vmatprep.subr.bf16.mxu1 %v4347_v56  ;;  %3859 = vmatprep.subr.bf16.mxu0 %v4378_v13 }
 0x1e9   :  { %2690 = vmatpush1.bf16.msra.mxu1 %v4345_v14  ;;  %3860 = vmatpush3.bf16.msra.mxu0 %v4379_v19 }
 0x1ea   :  { %2691 = vmatprep.subr.bf16.mxu1 %v4350_v15  ;;  %3861 = vmatprep.subr.bf16.mxu0 %v4383_v16 }
 0x1ed   :  { %2692 = vmatpush1.bf16.msra.mxu1 %v4348_v17  ;;  %3862 = vmatpush3.bf16.msra.mxu0 %v4384_v18 }
 0x1ee   :  { %2693 = vmatprep.subr.bf16.mxu1 %v4353_v20  ;;  %3863 = vmatprep.subr.bf16.mxu0 %v4388_v21 }
 0x1f1   :  { %2694 = vmatpush1.bf16.msra.mxu1 %v4351_v22  ;;  %3864 = vmatpush3.bf16.msra.mxu0 %v4389_v23  ;;  %v4400_v23 = vld [vmem:[#allocation6 + $0x180] ss:$12 sps:$4 sm:$0xff]  }
 0x1f2   :  { %2695 = vmatprep.subr.bf16.mxu1 %v4356_v24  ;;  %3865 = vmatprep.subr.bf16.mxu0 %v4393_v42  ;;  %v4404_v24 = vld [vmem:[#allocation6 + $0x188] ss:$12 sps:$4 sm:$0xff]  }
 0x1f3   :  { %v4427_v42 = vld [vmem:[#allocation6 + $0x1fc] ss:$12 sps:$4 sm:$0xff]  }
 0x1f5   :  { %2696 = vmatpush1.bf16.msra.mxu1 %v4354_v25  ;;  %3866 = vmatpush3.bf16.msra.mxu0 %v4394_v44  ;;  %v4407_v25 = vld [vmem:[#allocation6 + $0x19c] ss:$12 sps:$4 sm:$0xff]   ;;  %v4425_v44 = vld [vmem:[#allocation6 + $0x1f8] ss:$12 sps:$4 sm:$0xff]  }
 0x1f6   :  { %2697 = vmatprep.subr.bf16.mxu1 %v4359_v26  ;;  %3867 = vmatprep.subr.bf16.mxu0 %v4398_v46  ;;  %v4408_v26 = vld [vmem:[#allocation6 + $0x260] ss:$12 sps:$4 sm:$0xff]  }
 0x1f7   :  { %v4432_v46 = vld [vmem:[#allocation6 + $0x214] ss:$12 sps:$4 sm:$0xff]  }
 0x1f9   :  { %2698 = vmatpush1.bf16.msra.mxu1 %v4357_v27  ;;  %3868 = vmatpush3.bf16.msra.mxu0 %v4399_v48  ;;  %v4405_v27 = vld [vmem:[#allocation6 + $0x198] ss:$12 sps:$4 sm:$0xff]   ;;  %v4430_v48 = vld [vmem:[#allocation6 + $0x210] ss:$12 sps:$4 sm:$0xff]  }
 0x1fa   :  { %2699 = vmatprep.subr.bf16.mxu1 %v4362_v28  ;;  %3875 = vmatprep.subr.bf16.mxu0 %v4403_v50  ;;  %v4409_v28 = vld [vmem:[#allocation6 + $0x1a0] ss:$12 sps:$4 sm:$0xff]  }
 0x1fb   :  { %v4437_v50 = vld [vmem:[#allocation6 + $0x22c] ss:$12 sps:$4 sm:$0xff]  }
 0x1fd   :  { %2700 = vmatpush1.bf16.msra.mxu1 %v4360_v29  ;;  %v4412_v29 = vld [vmem:[#allocation6 + $0x1b4] ss:$12 sps:$4 sm:$0xff]  }
 0x1fe   :  { %2701 = vmatprep.subr.bf16.mxu1 %v4367_v30  ;;  %v4413_v30 = vld [vmem:[#allocation6 + $0x278] ss:$12 sps:$4 sm:$0xff]  }
 0x201   :  { %2702 = vmatpush1.bf16.msra.mxu1 %v4365_v31  ;;  %v4410_v31 = vld [vmem:[#allocation6 + $0x1b0] ss:$12 sps:$4 sm:$0xff]  }
 0x202   :  { %2703 = vmatprep.subr.bf16.mxu1 %v4372_v32  ;;  %v4414_v32 = vld [vmem:[#allocation6 + $0x1b8] ss:$12 sps:$4 sm:$0xff]  }
 0x205   :  { %2704 = vmatpush1.bf16.msra.mxu1 %v4370_v33  ;;  %v4417_v33 = vld [vmem:[#allocation6 + $0x1cc] ss:$12 sps:$4 sm:$0xff]  }
 0x206   :  { %2705 = vmatprep.subr.bf16.mxu1 %v4377_v34  ;;  %v4418_v34 = vld [vmem:[#allocation6 + $0x290] ss:$12 sps:$4 sm:$0xff]  }
 0x209   :  { %2706 = vmatpush1.bf16.msra.mxu1 %v4375_v35  ;;  %v4415_v35 = vld [vmem:[#allocation6 + $0x1c8] ss:$12 sps:$4 sm:$0xff]  }
 0x20a   :  { %2707 = vmatprep.subr.bf16.mxu1 %v4382_v36  ;;  %v4419_v36 = vld [vmem:[#allocation6 + $0x1d0] ss:$12 sps:$4 sm:$0xff]  }
 0x20d   :  { %2708 = vmatpush1.bf16.msra.mxu1 %v4380_v37  ;;  %v4422_v37 = vld [vmem:[#allocation6 + $0x1e4] ss:$12 sps:$4 sm:$0xff]  }
 0x20e   :  { %2709 = vmatprep.subr.bf16.mxu1 %v4387_v38  ;;  %v4423_v38 = vld [vmem:[#allocation6 + $0x2a8] ss:$12 sps:$4 sm:$0xff]  }
 0x211   :  { %2710 = vmatpush1.bf16.msra.mxu1 %v4385_v40  ;;  %v4420_v40 = vld [vmem:[#allocation6 + $0x1e0] ss:$12 sps:$4 sm:$0xff]  }
 0x212   :  { %2711 = vmatprep.subr.bf16.mxu1 %v4392_v41  ;;  %v4424_v41 = vld [vmem:[#allocation6 + $0x1e8] ss:$12 sps:$4 sm:$0xff]  }
 0x215   :  { %2712 = vmatpush1.bf16.msra.mxu1 %v4390_v43  ;;  %v4428_v43 = vld [vmem:[#allocation6 + $0x2c0] ss:$12 sps:$4 sm:$0xff]  }
 0x216   :  { %2713 = vmatprep.subr.bf16.mxu1 %v4397_v45  ;;  %v4429_v45 = vld [vmem:[#allocation6 + $0x200] ss:$12 sps:$4 sm:$0xff]  }
 0x219   :  { %2714 = vmatpush1.bf16.msra.mxu1 %v4395_v47  ;;  %v4433_v47 = vld [vmem:[#allocation6 + $0x2d8] ss:$12 sps:$4 sm:$0xff]  }
 0x21a   :  { %2726 = vmatprep.subr.bf16.mxu1 %v4402_v49  ;;  %v4434_v49 = vld [vmem:[#allocation6 + $0x218] ss:$12 sps:$4 sm:$0xff]  }
 0x2af   :  { %v1876_v60 = vpop.f32.mrb[4].mxu1  ;;  %v2005_v61 = vpop.f32.mrb[8].mxu0 }
 0x2b0   :  { %v3919_v62 = vadd.f32 %v1876_v60, %v779_v52  ;;  %v3923_v63 = vadd.f32 %v2005_v61, %v787_v53  ;;  %v1878_v1 = vpop.f32.mrb[5].mxu1  ;;  %v2007_v2 = vpop.f32.mrb[9].mxu0  ;;  %v4445_v60 = vld [vmem:[#allocation6 + $0x25c] ss:$12 sps:$4 sm:$0xff]   ;;  %v4443_v61 = vld [vmem:[#allocation6 + $0x258] ss:$12 sps:$4 sm:$0xff]  }
 0x2b1   :  { %v3920_v3 = vadd.f32 %v1878_v1, %v783_v58  ;;  %v3924_v4 = vadd.f32 %v2007_v2, %v791_v59  ;;  %v1880_v5 = vpop.f32.mrb[6].mxu1  ;;  %v2009_v39 = vpop.f32.mrb[10].mxu0  ;;  %v4451_v1 = vld [vmem:[#allocation6 + $0x28c] ss:$12 sps:$4 sm:$0xff]   ;;  %v4449_v2 = vld [vmem:[#allocation6 + $0x288] ss:$12 sps:$4 sm:$0xff]  }
 0x2b2   :  { %v3921_v6 = vadd.f32 %v1880_v5, %v779_v52  ;;  %v3925_v8 = vadd.f32 %v2009_v39, %v787_v53  ;;  %v1882_v9 = vpop.f32.mrb[7].mxu1  ;;  %v2011_v11 = vpop.f32.mrb[11].mxu0  ;;  %v2014_v13 = vmax.f32 %v3919_v62, 0.0  ;;  %v2016_v14 = vmax.f32 %v3923_v63, 0.0  ;;  %v4435_v52 = vld [vmem:[#allocation6 + $0x228] ss:$12 sps:$4 sm:$0xff]  }
 0x2b3   :  { %v3922_v12 = vadd.f32 %v1882_v9, %v783_v58  ;;  %v3926_v56 = vadd.f32 %v2011_v11, %v791_v59  ;;  %v2015_v19 = vmax.f32 %v3920_v3, 0.0  ;;  %v2017_v15 = vmax.f32 %v3924_v4, 0.0  ;;  %v4439_v53 = vld [vmem:[#allocation6 + $0x230] ss:$12 sps:$4 sm:$0xff]   ;;  %v4440_v59 = vld [vmem:[#allocation6 + $0x240] ss:$12 sps:$4 sm:$0xff]  }
 0x2b4   :  { %v2018_v54 = vmax.f32 %v3921_v6, 0.0  ;;  %v2020_v10 = vmax.f32 %v3925_v8, 0.0  ;;  %v4442_v58 = vld [vmem:[#allocation6 + $0x244] ss:$12 sps:$4 sm:$0xff]   ;;  %v4448_v62 = vld [vmem:[#allocation6 + $0x274] ss:$12 sps:$4 sm:$0xff]  }
 0x2b5   :  { %v2019_v16 = vmax.f32 %v3922_v12, 0.0  ;;  %v2021_v17 = vmax.f32 %v3926_v56, 0.0  ;;  %v4446_v63 = vld [vmem:[#allocation6 + $0x270] ss:$12 sps:$4 sm:$0xff]   ;;  %v4452_v4 = vld [vmem:[#allocation6 + $0x2a0] ss:$12 sps:$4 sm:$0xff]  }
 0x2b6   :  { %v2022_v18 = vpack.c.bf16 %v2018_v54, %v2014_v13  ;;  %v4873_v20 = vpack.c.bf16 %v2020_v10, %v2016_v14  ;;  %v4454_v3 = vld [vmem:[#allocation6 + $0x2a4] ss:$12 sps:$4 sm:$0xff]   ;;  %v4457_v5 = vld [vmem:[#allocation6 + $0x2bc] ss:$12 sps:$4 sm:$0xff]   ;;  %v4460_v6 = vld [vmem:[#allocation6 + $0x2d4] ss:$12 sps:$4 sm:$0xff]  }
 0x2b7   :  { %v2023_v21 = vpack.c.bf16 %v2019_v16, %v2015_v19  ;;  %v2025_v22 = vpack.c.bf16 %v2021_v17, %v2017_v15  ;;  %v4455_v39 = vld [vmem:[#allocation6 + $0x2b8] ss:$12 sps:$4 sm:$0xff]   ;;  %v4458_v8 = vld [vmem:[#allocation6 + $0x2d0] ss:$12 sps:$4 sm:$0xff]   ;;  %v4461_v11 = vld [vmem:[#allocation6 + $0x2e8] ss:$12 sps:$4 sm:$0xff]  }
 0x2b8   :  { %v4463_v9 = vld [vmem:[#allocation6 + $0x2ec] ss:$12 sps:$4 sm:$0xff]   ;;  %v4464_v12 = vld [vmem:[#allocation7] ss:$8 sps:$4 sm:$0xff]   ;;  %v4469_v13 = vld [vmem:[#allocation7 + $0x14] ss:$8 sps:$4 sm:$0xff]  }
 0x2b9   :  { %2715 = vmatprep.mubr.bf16.mxu1 %v2023_v21  ;;  %2801 = vmatprep.mubr.bf16.mxu0 %v2023_v21  ;;  %v4466_v56 = vld [vmem:[#allocation7 + $0x4] ss:$8 sps:$4 sm:$0xff]   ;;  %v4467_v14 = vld [vmem:[#allocation7 + $0x10] ss:$8 sps:$4 sm:$0xff]   ;;  %v4470_v10 = vld [vmem:[#allocation7 + $0x20] ss:$8 sps:$4 sm:$0xff]  }
 0x2ba   :  { %2716 = vmatmul.mubr.bf16.vlgmr.msra.gmra.mrb[8].mxu1 %v2022_v18  ;;  %2802 = vmatmul.mubr.bf16.vlgmr.msra.gmra.mrb[12].mxu0 %v2022_v18  ;;  %v4472_v54 = vld [vmem:[#allocation7 + $0x24] ss:$8 sps:$4 sm:$0xff]   ;;  %v4475_v19 = vld [vmem:[#allocation7 + $0x34] ss:$8 sps:$4 sm:$0xff]   ;;  %v4473_v15 = vld [vmem:[#allocation7 + $0x30] ss:$8 sps:$4 sm:$0xff]  }
 0x2bb   :  { %2727 = vmatpush1.bf16.msra.mxu1 %v4400_v23  ;;  %3876 = vmatpush3.bf16.msra.mxu0 %v4404_v24  ;;  %v4478_v16 = vld [vmem:[#allocation7 + $0x44] ss:$8 sps:$4 sm:$0xff]   ;;  %v4476_v17 = vld [vmem:[#allocation7 + $0x40] ss:$8 sps:$4 sm:$0xff]   ;;  %v4481_v18 = vld [vmem:[#allocation7 + $0x54] ss:$8 sps:$4 sm:$0xff]  }
 0x2bc   :  { %2758 = vmatprep.mubr.bf16.mxu1 %v2025_v22  ;;  %2842 = vmatprep.mubr.bf16.mxu0 %v2025_v22  ;;  %v4484_v21 = vld [vmem:[#allocation7 + $0x64] ss:$8 sps:$4 sm:$0xff]   ;;  %v4482_v22 = vld [vmem:[#allocation7 + $0x60] ss:$8 sps:$4 sm:$0xff]   ;;  %v4487_v23 = vld [vmem:[#allocation7 + $0x74] ss:$8 sps:$4 sm:$0xff]  }
 0x2bd   :  { %2728 = vmatprep.subr.bf16.mxu1 %v4407_v25  ;;  %3877 = vmatprep.subr.bf16.mxu0 %v4408_v26  ;;  %v4485_v24 = vld [vmem:[#allocation7 + $0x70] ss:$8 sps:$4 sm:$0xff]   ;;  %v4490_v25 = vld [vmem:[#allocation7 + $0x84] ss:$8 sps:$4 sm:$0xff]   ;;  %v4488_v26 = vld [vmem:[#allocation7 + $0x80] ss:$8 sps:$4 sm:$0xff]  }
 0x2bf   :  { %2729 = vmatpush1.bf16.msra.mxu1 %v4405_v27  ;;  %3878 = vmatpush3.bf16.msra.mxu0 %v4409_v28  ;;  %v4493_v27 = vld [vmem:[#allocation7 + $0x94] ss:$8 sps:$4 sm:$0xff]   ;;  %v4491_v28 = vld [vmem:[#allocation7 + $0x90] ss:$8 sps:$4 sm:$0xff]  }
 0x2c0   :  { %2730 = vmatprep.subr.bf16.mxu1 %v4412_v29  ;;  %3879 = vmatprep.subr.bf16.mxu0 %v4413_v30  ;;  %v4496_v29 = vld [vmem:[#allocation7 + $0xa4] ss:$8 sps:$4 sm:$0xff]   ;;  %v4494_v30 = vld [vmem:[#allocation7 + $0xa0] ss:$8 sps:$4 sm:$0xff]  }
 0x2c3   :  { %2731 = vmatpush1.bf16.msra.mxu1 %v4410_v31  ;;  %3880 = vmatpush3.bf16.msra.mxu0 %v4414_v32  ;;  %v4499_v31 = vld [vmem:[#allocation7 + $0xb4] ss:$8 sps:$4 sm:$0xff]   ;;  %v4497_v32 = vld [vmem:[#allocation7 + $0xb0] ss:$8 sps:$4 sm:$0xff]  }
 0x2c4   :  { %2732 = vmatprep.subr.bf16.mxu1 %v4417_v33  ;;  %3881 = vmatprep.subr.bf16.mxu0 %v4418_v34  ;;  %v4502_v33 = vld [vmem:[#allocation7 + $0xc4] ss:$8 sps:$4 sm:$0xff]   ;;  %v4500_v34 = vld [vmem:[#allocation7 + $0xc0] ss:$8 sps:$4 sm:$0xff]  }
 0x2c7   :  { %2733 = vmatpush1.bf16.msra.mxu1 %v4415_v35  ;;  %3882 = vmatpush3.bf16.msra.mxu0 %v4419_v36  ;;  %v4505_v35 = vld [vmem:[#allocation7 + $0xd4] ss:$8 sps:$4 sm:$0xff]   ;;  %v4503_v36 = vld [vmem:[#allocation7 + $0xd0] ss:$8 sps:$4 sm:$0xff]  }
 0x2c8   :  { %2734 = vmatprep.subr.bf16.mxu1 %v4422_v37  ;;  %3883 = vmatprep.subr.bf16.mxu0 %v4423_v38  ;;  %v4508_v37 = vld [vmem:[#allocation7 + $0xe4] ss:$8 sps:$4 sm:$0xff]   ;;  %v4506_v38 = vld [vmem:[#allocation7 + $0xe0] ss:$8 sps:$4 sm:$0xff]  }
 0x2cb   :  { %2735 = vmatpush1.bf16.msra.mxu1 %v4420_v40  ;;  %3884 = vmatpush3.bf16.msra.mxu0 %v4424_v41  ;;  %v4511_v40 = vld [vmem:[#allocation7 + $0xf4] ss:$8 sps:$4 sm:$0xff]   ;;  %v4509_v41 = vld [vmem:[#allocation7 + $0xf0] ss:$8 sps:$4 sm:$0xff]  }
 0x2cc   :  { %2736 = vmatprep.subr.bf16.mxu1 %v4427_v42  ;;  %3885 = vmatprep.subr.bf16.mxu0 %v4428_v43  ;;  %v4514_v42 = vld [vmem:[#allocation7 + $0x104] ss:$8 sps:$4 sm:$0xff]  }
 0x2cd   :  { %v4536_v43 = vld [vmem:[#allocation9 + $0x40] sm:$0xff]  }
 0x2cf   :  { %2737 = vmatpush1.bf16.msra.mxu1 %v4425_v44  ;;  %3886 = vmatpush3.bf16.msra.mxu0 %v4429_v45  ;;  %v4537_v44 = vld [vmem:[#allocation9] sm:$0xff]   ;;  %v4538_v45 = vld [vmem:[#allocation9 + $0x48] sm:$0xff]  }
 0x2d0   :  { %2738 = vmatprep.subr.bf16.mxu1 %v4432_v46  ;;  %3887 = vmatprep.subr.bf16.mxu0 %v4433_v47  ;;  %v4539_v46 = vld [vmem:[#allocation9 + $0x8] sm:$0xff]   ;;  %v4540_v47 = vld [vmem:[#allocation9 + $0x50] sm:$0xff]  }
 0x2d3   :  { %2739 = vmatpush1.bf16.msra.mxu1 %v4430_v48  ;;  %3888 = vmatpush3.bf16.msra.mxu0 %v4434_v49  ;;  %v4541_v48 = vld [vmem:[#allocation9 + $0x10] sm:$0xff]   ;;  %v4542_v49 = vld [vmem:[#allocation9 + $0x58] sm:$0xff]  }
 0x2d4   :  { %2740 = vmatprep.subr.bf16.mxu1 %v4437_v50  ;;  %3889 = vmatprep.subr.bf16.mxu0 %v4438_v51  ;;  %v4543_v50 = vld [vmem:[#allocation9 + $0x18] sm:$0xff]   ;;  %v4544_v51 = vld [vmem:[#allocation9 + $0x60] sm:$0xff]  }
 0x2d7   :  { %2741 = vmatpush1.bf16.msra.mxu1 %v4435_v52  ;;  %3890 = vmatpush3.bf16.msra.mxu0 %v4439_v53  ;;  %v4545_v52 = vld [vmem:[#allocation9 + $0x20] sm:$0xff]   ;;  %v4546_v53 = vld [vmem:[#allocation9 + $0x68] sm:$0xff]  }
 0x2d8   :  { %2742 = vmatprep.subr.bf16.mxu1 %v4442_v58  ;;  %3160 = vmatprep.subr.bf16.mxu0 %v4466_v56 }
 0x2da   :  { %2843 = vmatmul.mubr.bf16.vlgmr.msra.gmra.mrb[16].mxu0 %v4873_v20 }
 0x2db   :  { %2743 = vmatpush1.bf16.msra.mxu1 %v4440_v59  ;;  %3161 = vmatpush1.bf16.msra.mxu0 %v4464_v12 }
 0x2dc   :  { %2744 = vmatprep.subr.bf16.mxu1 %v4445_v60  ;;  %3162 = vmatprep.subr.bf16.mxu0 %v4469_v13 }
 0x2df   :  { %2745 = vmatpush1.bf16.msra.mxu1 %v4443_v61  ;;  %3163 = vmatpush1.bf16.msra.mxu0 %v4467_v14 }
 0x2e0   :  { %2746 = vmatprep.subr.bf16.mxu1 %v4448_v62  ;;  %3164 = vmatprep.subr.bf16.mxu0 %v4472_v54 }
 0x2e3   :  { %2747 = vmatpush1.bf16.msra.mxu1 %v4446_v63  ;;  %3165 = vmatpush1.bf16.msra.mxu0 %v4470_v10 }
 0x2e4   :  { %2748 = vmatprep.subr.bf16.mxu1 %v4451_v1  ;;  %3166 = vmatprep.subr.bf16.mxu0 %v4475_v19  ;;  %v2154_v1 = vld [vmem:[%s4904_s6] sm:$0x7] }
 0x2e5   :  { %v2159_v10 = vrot.slane %v2154_v1, %v4826_v55  ;;  %v2163_v19 = vrot.slane %v2154_v1, %v4834_v57 }
 0x2e7   :  { %2749 = vmatpush1.bf16.msra.mxu1 %v4449_v2  ;;  %3167 = vmatpush1.bf16.msra.mxu0 %v4473_v15  ;;  %v2167_v2 = vrot.slane %v2154_v1, %v4841_v7 }
 0x2e8   :  { %2750 = vmatprep.subr.bf16.mxu1 %v4454_v3  ;;  %3168 = vmatprep.subr.bf16.mxu0 %v4478_v16 }
 0x2eb   :  { %2751 = vmatpush1.bf16.msra.mxu1 %v4452_v4  ;;  %3169 = vmatpush1.bf16.msra.mxu0 %v4476_v17 }
 0x2ec   :  { %2752 = vmatprep.subr.bf16.mxu1 %v4457_v5  ;;  %3170 = vmatprep.subr.bf16.mxu0 %v4481_v18 }
 0x2ef   :  { %2753 = vmatpush1.bf16.msra.mxu1 %v4455_v39 }
 0x2f0   :  { %2754 = vmatprep.subr.bf16.mxu1 %v4460_v6 }
 0x2f3   :  { %2755 = vmatpush1.bf16.msra.mxu1 %v4458_v8 }
 0x2f4   :  { %2756 = vmatprep.subr.bf16.mxu1 %v4463_v9 }
 0x2f7   :  { %2757 = vmatpush1.bf16.msra.mxu1 %v4461_v11 }
 0x2f8   :  { %3897 = vmatprep.subr.bf16.mxu1 %v4536_v43  ;;  %v4533_v43 = vld [vmem:[#allocation7 + $0x170] ss:$8 sps:$4 sm:$0xff]  }
 0x2fa   :  { %2759 = vmatmul.mubr.bf16.vlgmr.msra.gmra.mrb[8].mxu1 %v4873_v20  ;;  %v4479_v20 = vld [vmem:[#allocation7 + $0x50] ss:$8 sps:$4 sm:$0xff]  }
 0x2fb   :  { %3171 = vmatpush1.bf16.msra.mxu0 %v4479_v20  ;;  %3898 = vmatpush3.bf16.msra.mxu1 %v4537_v44  ;;  %v4547_v44 = vld [vmem:[#allocation9 + $0x28] sm:$0xff]  }
 0x2fc   :  { %3172 = vmatprep.subr.bf16.mxu0 %v4484_v21  ;;  %3899 = vmatprep.subr.bf16.mxu1 %v4538_v45  ;;  %v4548_v45 = vld [vmem:[#allocation9 + $0x70] sm:$0xff]  }
 0x2ff   :  { %3173 = vmatpush1.bf16.msra.mxu0 %v4482_v22  ;;  %3900 = vmatpush3.bf16.msra.mxu1 %v4539_v46  ;;  %v4549_v46 = vld [vmem:[#allocation9 + $0x30] sm:$0xff]  }
 0x300   :  { %3174 = vmatprep.subr.bf16.mxu0 %v4487_v23  ;;  %3901 = vmatprep.subr.bf16.mxu1 %v4540_v47  ;;  %v4550_v47 = vld [vmem:[#allocation9 + $0x78] sm:$0xff]  }
 0x303   :  { %3175 = vmatpush1.bf16.msra.mxu0 %v4485_v24  ;;  %3902 = vmatpush3.bf16.msra.mxu1 %v4541_v48  ;;  %v4551_v48 = vld [vmem:[#allocation9 + $0x38] sm:$0xff]  }
 0x304   :  { %3176 = vmatprep.subr.bf16.mxu0 %v4490_v25  ;;  %3903 = vmatprep.subr.bf16.mxu1 %v4542_v49  ;;  %v2908_v49 = vld [vmem:[%s4906_s8] sm:$0x3] }
 0x307   :  { %3177 = vmatpush1.bf16.msra.mxu0 %v4488_v26  ;;  %3904 = vmatpush3.bf16.msra.mxu1 %v4543_v50  ;;  %v2913_v50 = vrot.slane %v2908_v49, %v4826_v55  ;;  %v3834_v55 = vld [vmem:[%s4908_s10] ss:$0 sm:$0xff] }
 0x308   :  { %3178 = vmatprep.subr.bf16.mxu0 %v4493_v27  ;;  %3905 = vmatprep.subr.bf16.mxu1 %v4544_v51  ;;  %v2917_v51 = vrot.slane %v2908_v49, %v4834_v57 }
 0x30b   :  { %3179 = vmatpush1.bf16.msra.mxu0 %v4491_v28  ;;  %3906 = vmatpush3.bf16.msra.mxu1 %v4545_v52 }
 0x30c   :  { %3180 = vmatprep.subr.bf16.mxu0 %v4496_v29  ;;  %3907 = vmatprep.subr.bf16.mxu1 %v4546_v53  ;;  %v4512_v29 = vld [vmem:[#allocation7 + $0x100] ss:$8 sps:$4 sm:$0xff]  }
 0x30f   :  { %3181 = vmatpush1.bf16.msra.mxu0 %v4494_v30  ;;  %v4517_v30 = vld [vmem:[#allocation7 + $0x114] ss:$8 sps:$4 sm:$0xff]   ;;  %3908 = vmatpush3.bf16.msra.mxu1 %v4547_v44 }
 0x310   :  { %3182 = vmatprep.subr.bf16.mxu0 %v4499_v31  ;;  %v4515_v31 = vld [vmem:[#allocation7 + $0x110] ss:$8 sps:$4 sm:$0xff]   ;;  %3909 = vmatprep.subr.bf16.mxu1 %v4548_v45 }
 0x313   :  { %3183 = vmatpush1.bf16.msra.mxu0 %v4497_v32  ;;  %v4520_v32 = vld [vmem:[#allocation7 + $0x124] ss:$8 sps:$4 sm:$0xff]   ;;  %3910 = vmatpush3.bf16.msra.mxu1 %v4549_v46 }
 0x314   :  { %3184 = vmatprep.subr.bf16.mxu0 %v4502_v33  ;;  %v4518_v33 = vld [vmem:[#allocation7 + $0x120] ss:$8 sps:$4 sm:$0xff]   ;;  %3911 = vmatprep.subr.bf16.mxu1 %v4550_v47 }
 0x317   :  { %3185 = vmatpush1.bf16.msra.mxu0 %v4500_v34  ;;  %v4523_v34 = vld [vmem:[#allocation7 + $0x134] ss:$8 sps:$4 sm:$0xff]   ;;  %3912 = vmatpush3.bf16.msra.mxu1 %v4551_v48 }
 0x318   :  { %3186 = vmatprep.subr.bf16.mxu0 %v4505_v35  ;;  %v4521_v35 = vld [vmem:[#allocation7 + $0x130] ss:$8 sps:$4 sm:$0xff]  }
 0x31b   :  { %3187 = vmatpush1.bf16.msra.mxu0 %v4503_v36  ;;  %v4526_v36 = vld [vmem:[#allocation7 + $0x144] ss:$8 sps:$4 sm:$0xff]  }
 0x31c   :  { %3188 = vmatprep.subr.bf16.mxu0 %v4508_v37  ;;  %v4524_v37 = vld [vmem:[#allocation7 + $0x140] ss:$8 sps:$4 sm:$0xff]  }
 0x31f   :  { %3189 = vmatpush1.bf16.msra.mxu0 %v4506_v38  ;;  %v4529_v38 = vld [vmem:[#allocation7 + $0x154] ss:$8 sps:$4 sm:$0xff]  }
 0x320   :  { %3190 = vmatprep.subr.bf16.mxu0 %v4511_v40  ;;  %v4527_v40 = vld [vmem:[#allocation7 + $0x150] ss:$8 sps:$4 sm:$0xff]  }
 0x323   :  { %3191 = vmatpush1.bf16.msra.mxu0 %v4509_v41  ;;  %v4532_v41 = vld [vmem:[#allocation7 + $0x164] ss:$8 sps:$4 sm:$0xff]  }
 0x324   :  { %3203 = vmatprep.subr.bf16.mxu0 %v4514_v42  ;;  %v4535_v42 = vld [vmem:[#allocation7 + $0x174] ss:$8 sps:$4 sm:$0xff]  }
 0x38d   :  { %v3869_v58 = vpop.f32.mrb[12].mxu0 }
 0x38e   :  { %v3870_v59 = vpop.f32.mrb[13].mxu0 }
 0x38f   :  { %v3871_v60 = vadd.f32 %v3870_v59, %v3869_v58  ;;  %v3872_v61 = vpop.f32.mrb[14].mxu0 }
 0x390   :  { %v3873_v62 = vpop.f32.mrb[15].mxu0 }
 0x391   :  { %v3874_v63 = vadd.f32 %v3873_v62, %v3872_v61  ;;  %v2804_v5 = vadd.f32 %v3871_v60, %v2167_v2 }
 0x393   :  { %v2807_v9 = vadd.f32 %v3874_v63, %v2167_v2 }
 0x3ad   :  { %v3891_v3 = vpop.f32.mrb[16].mxu0 }
 0x3ae   :  { %v3892_v4 = vpop.f32.mrb[17].mxu0 }
 0x3af   :  { %v3893_v39 = vadd.f32 %v3892_v4, %v3891_v3  ;;  %v3894_v6 = vpop.f32.mrb[18].mxu0 }
 0x3b0   :  { %v3895_v8 = vpop.f32.mrb[19].mxu0 }
 0x3b1   :  { %v2845_v11 = vadd.f32 %v3893_v39, %v2804_v5  ;;  %v3896_v12 = vadd.f32 %v3895_v8, %v3894_v6 }
 0x3b3   :  { %v2848_v56 = vadd.f32 %v3896_v12, %v2807_v9  ;;  %v2853_v13 = vmax.f32 %v2845_v11, 0.0 }
 0x3b5   :  { %v2856_v14 = vmax.f32 %v2848_v56, 0.0 }
 0x3b7   :  { %v2859_v54 = vpack.c.bf16 %v2856_v14, %v2853_v13 }
 0x3cd   :  { %v2760_v15 = vpop.f32.mrb[8].mxu1 }
 0x3ce   :  { %v3927_v16 = vadd.f32 %v2760_v15, %v2159_v10  ;;  %v2762_v7 = vpop.f32.mrb[9].mxu1 }
 0x3cf   :  { %v3928_v17 = vadd.f32 %v2762_v7, %v2163_v19  ;;  %v2764_v18 = vpop.f32.mrb[10].mxu1 }
 0x3d0   :  { %v3929_v20 = vadd.f32 %v2764_v18, %v2159_v10  ;;  %v2766_v21 = vpop.f32.mrb[11].mxu1  ;;  %v2851_v23 = vmax.f32 %v3927_v16, 0.0 }
 0x3d1   :  { %v3930_v22 = vadd.f32 %v2766_v21, %v2163_v19  ;;  %v2852_v25 = vmax.f32 %v3928_v17, 0.0 }
 0x3d2   :  { %v2854_v24 = vmax.f32 %v3929_v20, 0.0 }
 0x3d3   :  { %v2855_v26 = vmax.f32 %v3930_v22, 0.0 }
 0x3d4   :  { %v2857_v27 = vpack.c.bf16 %v2854_v24, %v2851_v23 }
 0x3d5   :  { %v2858_v28 = vpack.c.bf16 %v2855_v26, %v2852_v25 }
 0x3d7   :  { %3192 = vmatprep.mubr.bf16.mxu0 %v2858_v28 }
 0x3d8   :  { %3193 = vmatmul.mubr.bf16.vlgmr.msra.gmra.mrb[20].mxu0 %v2857_v27 }
 0x3d9   :  { %3204 = vmatpush1.bf16.msra.mxu0 %v4512_v29  ;;  %3235 = vmatprep.mubr.bf16.mxu0 %v4691_v0  ;;  %v4530_v0 = vld [vmem:[#allocation7 + $0x160] ss:$8 sps:$4 sm:$0xff]  }
 0x3da   :  { %3205 = vmatprep.subr.bf16.mxu0 %v4517_v30 }
 0x3dd   :  { %3206 = vmatpush1.bf16.msra.mxu0 %v4515_v31 }
 0x3de   :  { %3207 = vmatprep.subr.bf16.mxu0 %v4520_v32 }
 0x3e1   :  { %3208 = vmatpush1.bf16.msra.mxu0 %v4518_v33 }
 0x3e2   :  { %3209 = vmatprep.subr.bf16.mxu0 %v4523_v34 }
 0x3e5   :  { %3210 = vmatpush1.bf16.msra.mxu0 %v4521_v35 }
 0x3e6   :  { %3211 = vmatprep.subr.bf16.mxu0 %v4526_v36 }
 0x3e9   :  { %3212 = vmatpush1.bf16.msra.mxu0 %v4524_v37 }
 0x3ea   :  { %3213 = vmatprep.subr.bf16.mxu0 %v4529_v38 }
 0x3ed   :  { %3214 = vmatpush1.bf16.msra.mxu0 %v4527_v40 }
 0x3ee   :  { %3215 = vmatprep.subr.bf16.mxu0 %v4532_v41 }
 0x3f1   :  { %3216 = vmatpush1.bf16.msra.mxu0 %v4530_v0 }
 0x3f2   :  { %3217 = vmatprep.subr.bf16.mxu0 %v4535_v42 }
 0x3f5   :  { %3218 = vmatpush1.bf16.msra.mxu0 %v4533_v43 }
 0x3f8   :  { %3236 = vmatmul.mubr.bf16.vlgmr.msra.gmra.mrb[20].mxu0 %v2859_v54 }
 0x4cb   :  { %v3237_v52 = vpop.f32.mrb[20].mxu0 }
 0x4cc   :  { %v3931_v53 = vadd.f32 %v3237_v52, %v2913_v50  ;;  %v3239_v58 = vpop.f32.mrb[21].mxu0 }
 0x4cd   :  { %v3932_v59 = vadd.f32 %v3239_v58, %v2917_v51  ;;  %v3241_v60 = vpop.f32.mrb[22].mxu0 }
 0x4ce   :  { %v3933_v61 = vadd.f32 %v3241_v60, %v2913_v50  ;;  %v3243_v62 = vpop.f32.mrb[23].mxu0  ;;  %v3246_v1 = vmax.f32 %v3931_v53, 0.0 }
 0x4cf   :  { %v3934_v63 = vadd.f32 %v3243_v62, %v2917_v51  ;;  %v3247_v3 = vmax.f32 %v3932_v59, 0.0 }
 0x4d0   :  { %v3248_v2 = vmax.f32 %v3933_v61, 0.0 }
 0x4d1   :  { %v3249_v4 = vmax.f32 %v3934_v63, 0.0 }
 0x4d2   :  { %v3250_v5 = vpack.c.bf16 %v3248_v2, %v3246_v1 }
 0x4d3   :  { %v3251_v39 = vpack.c.bf16 %v3249_v4, %v3247_v3 }
 0x4d5   :  { %3419 = vmatprep.mubr.bf16.mxu1 %v3251_v39 }
 0x4d6   :  { %3420 = vmatmul.mubr.bf16.vlgmr.msra.gmra.mrb[12].mxu1 %v3250_v5 }
 0x5a9   :  { %v3913_v6 = vpop.f32.mrb[12].mxu1 }
 0x5aa   :  { %v3914_v57 = vpop.f32.mrb[13].mxu1 }
 0x5ab   :  { %v3915_v8 = vadd.f32 %v3914_v57, %v3913_v6  ;;  %v3916_v9 = vpop.f32.mrb[14].mxu1 }
 0x5ac   :  { %v3917_v11 = vpop.f32.mrb[15].mxu1 }
 0x5ad   :  { %v3422_v12 = vadd.f32 %v3915_v8, %v3834_v55  ;;  %v3918_v56 = vadd.f32 %v3917_v11, %v3916_v9 }
 0x5af   :  { %v3851_v13 = vmul.f32 -1.442695, %v3422_v12  ;;  %v3425_v14 = vadd.f32 %v3918_v56, %v3834_v55 }
 0x5b1   :  { %4552 = vpow2.f32 %v3851_v13  ;;  %v3852_v54 = vmul.f32 -1.442695, %v3425_v14 }
 0x5b3   :  { %4554 = vpow2.f32 %v3852_v54 }
 0x5bb   :  { %v4553_v10 = vpop.eup %4552 }
 0x5bc   :  { %v3434_v19 = vadd.f32 1.0, %v4553_v10 }
 0x5bd   :  { %v4555_v15 = vpop.eup %4554 }
 0x5be   :  { %4556 = vrcp.f32 %v3434_v19  ;;  %v3435_v16 = vadd.f32 1.0, %v4555_v15 }
 0x5c0   :  { %4558 = vrcp.f32 %v3435_v16 }
 0x5c8   :  { %v4557_v7 = vpop.eup %4556 }
 0x5c9   :  { %3440 = vst [vmem:[%s4909_s11] sm:$0xff] %v4557_v7 }
 0x5ca   :  { %v4559_v17 = vpop.eup %4558 }
 0x5cb   :  { %3441 = vst [vmem:[%s4909_s11 + $0x8] sm:$0xff] %v4559_v17 }
 0x5cc   :  { %3446 = vsyncpa [#allocation3], 1 }
 0x5cd   :  { %3447 = vsyncpa [#allocation5], 1 }
 0x5ce   :  { %3448 = vsyncpa [#allocation8], 1 }

</bundles_post_ra>
